<compile_context>
chip_gen: v7x
topology: tpu7x:2x2x1
jax: 0.10.0
libtpu: 0.0.40
codegen_flags: <defaults>
</compile_context>

<pallas_src>
import functools

import jax
import jax.numpy as jnp
from jax import lax
from jax.experimental import pallas as pl
from jax.experimental.pallas import tpu as pltpu


# ---------------------------------------------------------------------------
# Fused kernel: all LSTM layers + classifier in one pallas_call
# ---------------------------------------------------------------------------
def fused_rnn_kernel(x_ref, *refs, n_layer, T, B):
    """Fused multi-layer LSTM + final Linear.

    x_ref : [T*B, D]  time-major flattened input sequence (VMEM)
    refs  : for each layer l: wih [D_l, 4H], whh [H, 4H], b [1, 4H]
            then cls_w [H, C], cls_b [1, C], out_ref [B, C]
    """
    lstm_refs = refs[: 3 * n_layer]
    cls_w_ref = refs[3 * n_layer]
    cls_b_ref = refs[3 * n_layer + 1]
    out_ref = refs[3 * n_layer + 2]

    seq = x_ref[...].astype(jnp.float32)              # [T*B, D_in], time-major
    h_last = None
    for l in range(n_layer):
        wih = lstm_refs[3 * l][...]                   # [D, 4H]
        whh = lstm_refs[3 * l + 1][...]               # [H, 4H]
        b = lstm_refs[3 * l + 2][...]                 # [1, 4H]
        H = whh.shape[0]

        # Hoisted input projection + bias: one big lane-dense matmul, off the
        # serial critical path.  gates_x: [T*B, 4H]
        gates_x = jnp.dot(seq, wih, preferred_element_type=jnp.float32) + b

        h = jnp.zeros((B, H), jnp.float32)
        c = jnp.zeros((B, H), jnp.float32)
        hs = []
        is_last = l == n_layer - 1
        for t in range(T):                            # static unroll: T is small
            g_row = gates_x[t * B:(t + 1) * B, :]     # sublane-aligned slice
            if t == 0:
                gates = g_row                         # h == 0 -> skip matmul
            else:
                gates = g_row + jnp.dot(
                    h, whh, preferred_element_type=jnp.float32
                )
            # Whole-vreg activations (EUP), then static lane slices.
            sig = jax.nn.sigmoid(gates)               # [B, 4H]
            tnh = jnp.tanh(gates)                     # [B, 4H]
            i_g = sig[:, 0:H]
            f_g = sig[:, H:2 * H]
            g_g = tnh[:, 2 * H:3 * H]
            o_g = sig[:, 3 * H:4 * H]
            c = f_g * c + i_g * g_g
            h = o_g * jnp.tanh(c)
            if not is_last:
                hs.append(h)
        if not is_last:
            # Inter-layer sequence stays on-chip as a value; never hits HBM.
            seq = jnp.concatenate(hs, axis=0)         # [T*B, H], time-major
        h_last = h

    # Classifier fused into the same kernel; only [B, C] leaves the chip.
    out_ref[...] = (
        jnp.dot(h_last, cls_w_ref[...], preferred_element_type=jnp.float32)
        + cls_b_ref[...]
    ).astype(out_ref.dtype)


# ---------------------------------------------------------------------------
# Wrapper
# ---------------------------------------------------------------------------
_VMEM = pl.BlockSpec(memory_space=pltpu.MemorySpace.VMEM)


@jax.jit
def rnn_forward(x, params):
    """x: [B, T, in_dim] batch-first, like the PyTorch module."""
    B, T, D = x.shape
    C = params["cls_w"].shape[1]
    n_layer = len(params["lstm"])

    # Time-major flatten so gates_x[t] is a contiguous, sublane-aligned slab.
    x2d = jnp.transpose(x, (1, 0, 2)).reshape(T * B, D)

    flat = [x2d]
    for (wih_t, whh_t, b) in params["lstm"]:
        flat += [wih_t, whh_t, b]
    flat += [params["cls_w"], params["cls_b"]]

    kernel = functools.partial(fused_rnn_kernel, n_layer=n_layer, T=T, B=B)
    return pl.pallas_call(
        kernel,
        out_shape=jax.ShapeDtypeStruct((B, C), jnp.float32),
        in_specs=[_VMEM] * len(flat),
        out_specs=_VMEM,
    )(*flat)


# ---------------------------------------------------------------------------
# Deterministic parameter init (PyTorch-style U(-1/sqrt(H), 1/sqrt(H)))
# ---------------------------------------------------------------------------
def init_params(key, in_dim, hidden_dim, n_layer, n_class):
    bound = 1.0 / jnp.sqrt(jnp.float32(hidden_dim))
    lstm_params = []
    for layer in range(n_layer):
        d_in = in_dim if layer == 0 else hidden_dim
        key, k1, k2, k3, k4 = jax.random.split(key, 5)
        w_ih = jax.random.uniform(k1, (4 * hidden_dim, d_in), jnp.float32, -bound, bound)
        w_hh = jax.random.uniform(k2, (4 * hidden_dim, hidden_dim), jnp.float32, -bound, bound)
        b_ih = jax.random.uniform(k3, (4 * hidden_dim,), jnp.float32, -bound, bound)
        b_hh = jax.random.uniform(k4, (4 * hidden_dim,), jnp.float32, -bound, bound)
        lstm_params.append(
            (w_ih.T, w_hh.T, (b_ih + b_hh).reshape(1, 4 * hidden_dim))
        )
    key, k5, k6 = jax.random.split(key, 3)
    cls_bound = 1.0 / jnp.sqrt(jnp.float32(hidden_dim))
    cls_w = jax.random.uniform(k5, (n_class, hidden_dim), jnp.float32, -cls_bound, cls_bound)
    cls_b = jax.random.uniform(k6, (n_class,), jnp.float32, -cls_bound, cls_bound)
    return {"lstm": lstm_params, "cls_w": cls_w.T, "cls_b": cls_b.reshape(1, n_class)}


# ---------------------------------------------------------------------------
# Pure-JAX reference (silent correctness check)
# ---------------------------------------------------------------------------
def rnn_reference(x, params):
    xt = jnp.transpose(x, (1, 0, 2))
    for (wih_t, whh_t, b) in params["lstm"]:
        H = whh_t.shape[0]
        B = xt.shape[1]

        def step(carry, x_t):
            h, c = carry
            gates = x_t @ wih_t + h @ whh_t + b
            i = jax.nn.sigmoid(gates[:, 0 * H:1 * H])
            f = jax.nn.sigmoid(gates[:, 1 * H:2 * H])
            g = jnp.tanh(gates[:, 2 * H:3 * H])
            o = jax.nn.sigmoid(gates[:, 3 * H:4 * H])
            c_new = f * c + i * g
            h_new = o * jnp.tanh(c_new)
            return (h_new, c_new), h_new

        init = (jnp.zeros((B, H), jnp.float32), jnp.zeros((B, H), jnp.float32))
        _, out = lax.scan(step, init, xt)
        xt = out
    return xt[-1] @ params["cls_w"] + params["cls_b"]


# ---------------------------------------------------------------------------
if __name__ == "__main__":
    # Small shapes consistent with the module's forward.
    B, T, IN_DIM, HIDDEN, N_LAYER, N_CLASS = 8, 8, 16, 32, 2, 4

    key = jax.random.PRNGKey(0)
    key, kx = jax.random.split(key)
    x = jax.random.normal(kx, (B, T, IN_DIM), jnp.float32)

    params = init_params(key, IN_DIM, HIDDEN, N_LAYER, N_CLASS)

    out = rnn_forward(x, params)
    out = jax.block_until_ready(out)

    ref = jax.block_until_ready(rnn_reference(x, params))
    assert out.shape == (B, N_CLASS)
    assert jnp.allclose(out, ref, rtol=1e-4, atol=1e-4)

    print("KERNEL_OK")
</pallas_src>

<mosaic_0001>
module attributes {stable_mosaic.version = 11 : i64} {
  func.func @fused_rnn_kernel(%arg0: memref<64x16xf32, #tpu.memory_space<vmem>>, %arg1: memref<16x128xf32, #tpu.memory_space<vmem>>, %arg2: memref<32x128xf32, #tpu.memory_space<vmem>>, %arg3: memref<1x128xf32, #tpu.memory_space<vmem>>, %arg4: memref<32x128xf32, #tpu.memory_space<vmem>>, %arg5: memref<32x128xf32, #tpu.memory_space<vmem>>, %arg6: memref<1x128xf32, #tpu.memory_space<vmem>>, %arg7: memref<32x4xf32, #tpu.memory_space<vmem>>, %arg8: memref<1x4xf32, #tpu.memory_space<vmem>>, %arg9: memref<8x4xf32, #tpu.memory_space<vmem>>) attributes {dimension_semantics = [], scalar_prefetch = 0 : i64, scratch_operands = 0 : i64, tpu.core_type = #tpu.core_type<tc>} {
    %c0 = arith.constant 0 : index
    %c0_0 = arith.constant 0 : index
    %0 = vector.load %arg0[%c0, %c0_0] : memref<64x16xf32, #tpu.memory_space<vmem>>, vector<64x16xf32>
    %c0_1 = arith.constant 0 : index
    %c0_2 = arith.constant 0 : index
    %1 = vector.load %arg1[%c0_1, %c0_2] : memref<16x128xf32, #tpu.memory_space<vmem>>, vector<16x128xf32>
    %c0_3 = arith.constant 0 : index
    %c0_4 = arith.constant 0 : index
    %2 = vector.load %arg2[%c0_3, %c0_4] : memref<32x128xf32, #tpu.memory_space<vmem>>, vector<32x128xf32>
    %c0_5 = arith.constant 0 : index
    %c0_6 = arith.constant 0 : index
    %3 = vector.load %arg3[%c0_5, %c0_6] : memref<1x128xf32, #tpu.memory_space<vmem>>, vector<1x128xf32>
    %cst = arith.constant dense<0.000000e+00> : vector<64x128xf32>
    %4 = tpu.matmul %0, %1, %cst {dimension_numbers = #tpu.dot_dimension_numbers<[1], [0], [0], [1], [0, 0, 1, 1], [], []>} : vector<64x16xf32>, vector<16x128xf32>, vector<64x128xf32> -> vector<64x128xf32>
    %5 = vector.broadcast %3 : vector<1x128xf32> to vector<64x128xf32>
    %6 = arith.addf %4, %5 : vector<64x128xf32>
    %cst_7 = arith.constant 0.000000e+00 : f32
    %7 = vector.broadcast %cst_7 : f32 to vector<8x32xf32>
    %8 = vector.extract_strided_slice %6 {offsets = [0, 0], sizes = [8, 128], strides = [1, 1]} : vector<64x128xf32> to vector<8x128xf32>
    %9 = arith.negf %8 : vector<8x128xf32>
    %10 = math.exp %9 : vector<8x128xf32>
    %cst_8 = arith.constant 1.000000e+00 : f32
    %11 = vector.broadcast %cst_8 : f32 to vector<8x128xf32>
    %12 = arith.addf %11, %10 : vector<8x128xf32>
    %13 = arith.divf %11, %12 : vector<8x128xf32>
    %14 = math.tanh %8 : vector<8x128xf32>
    %15 = vector.extract_strided_slice %13 {offsets = [0, 0], sizes = [8, 32], strides = [1, 1]} : vector<8x128xf32> to vector<8x32xf32>
    %16 = vector.extract_strided_slice %13 {offsets = [0, 32], sizes = [8, 32], strides = [1, 1]} : vector<8x128xf32> to vector<8x32xf32>
    %17 = vector.extract_strided_slice %14 {offsets = [0, 64], sizes = [8, 32], strides = [1, 1]} : vector<8x128xf32> to vector<8x32xf32>
    %18 = vector.extract_strided_slice %13 {offsets = [0, 96], sizes = [8, 32], strides = [1, 1]} : vector<8x128xf32> to vector<8x32xf32>
    %19 = arith.mulf %16, %7 : vector<8x32xf32>
    %20 = arith.mulf %15, %17 : vector<8x32xf32>
    %21 = arith.addf %19, %20 : vector<8x32xf32>
    %22 = math.tanh %21 : vector<8x32xf32>
    %23 = arith.mulf %18, %22 : vector<8x32xf32>
    %24 = vector.extract_strided_slice %6 {offsets = [8, 0], sizes = [8, 128], strides = [1, 1]} : vector<64x128xf32> to vector<8x128xf32>
    %cst_9 = arith.constant dense<0.000000e+00> : vector<8x128xf32>
    %25 = tpu.matmul %23, %2, %cst_9 {dimension_numbers = #tpu.dot_dimension_numbers<[1], [0], [0], [1], [0, 0, 1, 1], [], []>} : vector<8x32xf32>, vector<32x128xf32>, vector<8x128xf32> -> vector<8x128xf32>
    %26 = arith.addf %24, %25 : vector<8x128xf32>
    %27 = arith.negf %26 : vector<8x128xf32>
    %28 = math.exp %27 : vector<8x128xf32>
    %cst_10 = arith.constant 1.000000e+00 : f32
    %29 = vector.broadcast %cst_10 : f32 to vector<8x128xf32>
    %30 = arith.addf %29, %28 : vector<8x128xf32>
    %31 = arith.divf %29, %30 : vector<8x128xf32>
    %32 = math.tanh %26 : vector<8x128xf32>
    %33 = vector.extract_strided_slice %31 {offsets = [0, 0], sizes = [8, 32], strides = [1, 1]} : vector<8x128xf32> to vector<8x32xf32>
    %34 = vector.extract_strided_slice %31 {offsets = [0, 32], sizes = [8, 32], strides = [1, 1]} : vector<8x128xf32> to vector<8x32xf32>
    %35 = vector.extract_strided_slice %32 {offsets = [0, 64], sizes = [8, 32], strides = [1, 1]} : vector<8x128xf32> to vector<8x32xf32>
    %36 = vector.extract_strided_slice %31 {offsets = [0, 96], sizes = [8, 32], strides = [1, 1]} : vector<8x128xf32> to vector<8x32xf32>
    %37 = arith.mulf %34, %21 : vector<8x32xf32>
    %38 = arith.mulf %33, %35 : vector<8x32xf32>
    %39 = arith.addf %37, %38 : vector<8x32xf32>
    %40 = math.tanh %39 : vector<8x32xf32>
    %41 = arith.mulf %36, %40 : vector<8x32xf32>
    %42 = vector.extract_strided_slice %6 {offsets = [16, 0], sizes = [8, 128], strides = [1, 1]} : vector<64x128xf32> to vector<8x128xf32>
    %cst_11 = arith.constant dense<0.000000e+00> : vector<8x128xf32>
    %43 = tpu.matmul %41, %2, %cst_11 {dimension_numbers = #tpu.dot_dimension_numbers<[1], [0], [0], [1], [0, 0, 1, 1], [], []>} : vector<8x32xf32>, vector<32x128xf32>, vector<8x128xf32> -> vector<8x128xf32>
    %44 = arith.addf %42, %43 : vector<8x128xf32>
    %45 = arith.negf %44 : vector<8x128xf32>
    %46 = math.exp %45 : vector<8x128xf32>
    %cst_12 = arith.constant 1.000000e+00 : f32
    %47 = vector.broadcast %cst_12 : f32 to vector<8x128xf32>
    %48 = arith.addf %47, %46 : vector<8x128xf32>
    %49 = arith.divf %47, %48 : vector<8x128xf32>
    %50 = math.tanh %44 : vector<8x128xf32>
    %51 = vector.extract_strided_slice %49 {offsets = [0, 0], sizes = [8, 32], strides = [1, 1]} : vector<8x128xf32> to vector<8x32xf32>
    %52 = vector.extract_strided_slice %49 {offsets = [0, 32], sizes = [8, 32], strides = [1, 1]} : vector<8x128xf32> to vector<8x32xf32>
    %53 = vector.extract_strided_slice %50 {offsets = [0, 64], sizes = [8, 32], strides = [1, 1]} : vector<8x128xf32> to vector<8x32xf32>
    %54 = vector.extract_strided_slice %49 {offsets = [0, 96], sizes = [8, 32], strides = [1, 1]} : vector<8x128xf32> to vector<8x32xf32>
    %55 = arith.mulf %52, %39 : vector<8x32xf32>
    %56 = arith.mulf %51, %53 : vector<8x32xf32>
    %57 = arith.addf %55, %56 : vector<8x32xf32>
    %58 = math.tanh %57 : vector<8x32xf32>
    %59 = arith.mulf %54, %58 : vector<8x32xf32>
    %60 = vector.extract_strided_slice %6 {offsets = [24, 0], sizes = [8, 128], strides = [1, 1]} : vector<64x128xf32> to vector<8x128xf32>
    %cst_13 = arith.constant dense<0.000000e+00> : vector<8x128xf32>
    %61 = tpu.matmul %59, %2, %cst_13 {dimension_numbers = #tpu.dot_dimension_numbers<[1], [0], [0], [1], [0, 0, 1, 1], [], []>} : vector<8x32xf32>, vector<32x128xf32>, vector<8x128xf32> -> vector<8x128xf32>
    %62 = arith.addf %60, %61 : vector<8x128xf32>
    %63 = arith.negf %62 : vector<8x128xf32>
    %64 = math.exp %63 : vector<8x128xf32>
    %cst_14 = arith.constant 1.000000e+00 : f32
    %65 = vector.broadcast %cst_14 : f32 to vector<8x128xf32>
    %66 = arith.addf %65, %64 : vector<8x128xf32>
    %67 = arith.divf %65, %66 : vector<8x128xf32>
    %68 = math.tanh %62 : vector<8x128xf32>
    %69 = vector.extract_strided_slice %67 {offsets = [0, 0], sizes = [8, 32], strides = [1, 1]} : vector<8x128xf32> to vector<8x32xf32>
    %70 = vector.extract_strided_slice %67 {offsets = [0, 32], sizes = [8, 32], strides = [1, 1]} : vector<8x128xf32> to vector<8x32xf32>
    %71 = vector.extract_strided_slice %68 {offsets = [0, 64], sizes = [8, 32], strides = [1, 1]} : vector<8x128xf32> to vector<8x32xf32>
    %72 = vector.extract_strided_slice %67 {offsets = [0, 96], sizes = [8, 32], strides = [1, 1]} : vector<8x128xf32> to vector<8x32xf32>
    %73 = arith.mulf %70, %57 : vector<8x32xf32>
    %74 = arith.mulf %69, %71 : vector<8x32xf32>
    %75 = arith.addf %73, %74 : vector<8x32xf32>
    %76 = math.tanh %75 : vector<8x32xf32>
    %77 = arith.mulf %72, %76 : vector<8x32xf32>
    %78 = vector.extract_strided_slice %6 {offsets = [32, 0], sizes = [8, 128], strides = [1, 1]} : vector<64x128xf32> to vector<8x128xf32>
    %cst_15 = arith.constant dense<0.000000e+00> : vector<8x128xf32>
    %79 = tpu.matmul %77, %2, %cst_15 {dimension_numbers = #tpu.dot_dimension_numbers<[1], [0], [0], [1], [0, 0, 1, 1], [], []>} : vector<8x32xf32>, vector<32x128xf32>, vector<8x128xf32> -> vector<8x128xf32>
    %80 = arith.addf %78, %79 : vector<8x128xf32>
    %81 = arith.negf %80 : vector<8x128xf32>
    %82 = math.exp %81 : vector<8x128xf32>
    %cst_16 = arith.constant 1.000000e+00 : f32
    %83 = vector.broadcast %cst_16 : f32 to vector<8x128xf32>
    %84 = arith.addf %83, %82 : vector<8x128xf32>
    %85 = arith.divf %83, %84 : vector<8x128xf32>
    %86 = math.tanh %80 : vector<8x128xf32>
    %87 = vector.extract_strided_slice %85 {offsets = [0, 0], sizes = [8, 32], strides = [1, 1]} : vector<8x128xf32> to vector<8x32xf32>
    %88 = vector.extract_strided_slice %85 {offsets = [0, 32], sizes = [8, 32], strides = [1, 1]} : vector<8x128xf32> to vector<8x32xf32>
    %89 = vector.extract_strided_slice %86 {offsets = [0, 64], sizes = [8, 32], strides = [1, 1]} : vector<8x128xf32> to vector<8x32xf32>
    %90 = vector.extract_strided_slice %85 {offsets = [0, 96], sizes = [8, 32], strides = [1, 1]} : vector<8x128xf32> to vector<8x32xf32>
    %91 = arith.mulf %88, %75 : vector<8x32xf32>
    %92 = arith.mulf %87, %89 : vector<8x32xf32>
    %93 = arith.addf %91, %92 : vector<8x32xf32>
    %94 = math.tanh %93 : vector<8x32xf32>
    %95 = arith.mulf %90, %94 : vector<8x32xf32>
    %96 = vector.extract_strided_slice %6 {offsets = [40, 0], sizes = [8, 128], strides = [1, 1]} : vector<64x128xf32> to vector<8x128xf32>
    %cst_17 = arith.constant dense<0.000000e+00> : vector<8x128xf32>
    %97 = tpu.matmul %95, %2, %cst_17 {dimension_numbers = #tpu.dot_dimension_numbers<[1], [0], [0], [1], [0, 0, 1, 1], [], []>} : vector<8x32xf32>, vector<32x128xf32>, vector<8x128xf32> -> vector<8x128xf32>
    %98 = arith.addf %96, %97 : vector<8x128xf32>
    %99 = arith.negf %98 : vector<8x128xf32>
    %100 = math.exp %99 : vector<8x128xf32>
    %cst_18 = arith.constant 1.000000e+00 : f32
    %101 = vector.broadcast %cst_18 : f32 to vector<8x128xf32>
    %102 = arith.addf %101, %100 : vector<8x128xf32>
    %103 = arith.divf %101, %102 : vector<8x128xf32>
    %104 = math.tanh %98 : vector<8x128xf32>
    %105 = vector.extract_strided_slice %103 {offsets = [0, 0], sizes = [8, 32], strides = [1, 1]} : vector<8x128xf32> to vector<8x32xf32>
    %106 = vector.extract_strided_slice %103 {offsets = [0, 32], sizes = [8, 32], strides = [1, 1]} : vector<8x128xf32> to vector<8x32xf32>
    %107 = vector.extract_strided_slice %104 {offsets = [0, 64], sizes = [8, 32], strides = [1, 1]} : vector<8x128xf32> to vector<8x32xf32>
    %108 = vector.extract_strided_slice %103 {offsets = [0, 96], sizes = [8, 32], strides = [1, 1]} : vector<8x128xf32> to vector<8x32xf32>
    %109 = arith.mulf %106, %93 : vector<8x32xf32>
    %110 = arith.mulf %105, %107 : vector<8x32xf32>
    %111 = arith.addf %109, %110 : vector<8x32xf32>
    %112 = math.tanh %111 : vector<8x32xf32>
    %113 = arith.mulf %108, %112 : vector<8x32xf32>
    %114 = vector.extract_strided_slice %6 {offsets = [48, 0], sizes = [8, 128], strides = [1, 1]} : vector<64x128xf32> to vector<8x128xf32>
    %cst_19 = arith.constant dense<0.000000e+00> : vector<8x128xf32>
    %115 = tpu.matmul %113, %2, %cst_19 {dimension_numbers = #tpu.dot_dimension_numbers<[1], [0], [0], [1], [0, 0, 1, 1], [], []>} : vector<8x32xf32>, vector<32x128xf32>, vector<8x128xf32> -> vector<8x128xf32>
    %116 = arith.addf %114, %115 : vector<8x128xf32>
    %117 = arith.negf %116 : vector<8x128xf32>
    %118 = math.exp %117 : vector<8x128xf32>
    %cst_20 = arith.constant 1.000000e+00 : f32
    %119 = vector.broadcast %cst_20 : f32 to vector<8x128xf32>
    %120 = arith.addf %119, %118 : vector<8x128xf32>
    %121 = arith.divf %119, %120 : vector<8x128xf32>
    %122 = math.tanh %116 : vector<8x128xf32>
    %123 = vector.extract_strided_slice %121 {offsets = [0, 0], sizes = [8, 32], strides = [1, 1]} : vector<8x128xf32> to vector<8x32xf32>
    %124 = vector.extract_strided_slice %121 {offsets = [0, 32], sizes = [8, 32], strides = [1, 1]} : vector<8x128xf32> to vector<8x32xf32>
    %125 = vector.extract_strided_slice %122 {offsets = [0, 64], sizes = [8, 32], strides = [1, 1]} : vector<8x128xf32> to vector<8x32xf32>
    %126 = vector.extract_strided_slice %121 {offsets = [0, 96], sizes = [8, 32], strides = [1, 1]} : vector<8x128xf32> to vector<8x32xf32>
    %127 = arith.mulf %124, %111 : vector<8x32xf32>
    %128 = arith.mulf %123, %125 : vector<8x32xf32>
    %129 = arith.addf %127, %128 : vector<8x32xf32>
    %130 = math.tanh %129 : vector<8x32xf32>
    %131 = arith.mulf %126, %130 : vector<8x32xf32>
    %132 = vector.extract_strided_slice %6 {offsets = [56, 0], sizes = [8, 128], strides = [1, 1]} : vector<64x128xf32> to vector<8x128xf32>
    %cst_21 = arith.constant dense<0.000000e+00> : vector<8x128xf32>
    %133 = tpu.matmul %131, %2, %cst_21 {dimension_numbers = #tpu.dot_dimension_numbers<[1], [0], [0], [1], [0, 0, 1, 1], [], []>} : vector<8x32xf32>, vector<32x128xf32>, vector<8x128xf32> -> vector<8x128xf32>
    %134 = arith.addf %132, %133 : vector<8x128xf32>
    %135 = arith.negf %134 : vector<8x128xf32>
    %136 = math.exp %135 : vector<8x128xf32>
    %cst_22 = arith.constant 1.000000e+00 : f32
    %137 = vector.broadcast %cst_22 : f32 to vector<8x128xf32>
    %138 = arith.addf %137, %136 : vector<8x128xf32>
    %139 = arith.divf %137, %138 : vector<8x128xf32>
    %140 = math.tanh %134 : vector<8x128xf32>
    %141 = vector.extract_strided_slice %139 {offsets = [0, 0], sizes = [8, 32], strides = [1, 1]} : vector<8x128xf32> to vector<8x32xf32>
    %142 = vector.extract_strided_slice %139 {offsets = [0, 32], sizes = [8, 32], strides = [1, 1]} : vector<8x128xf32> to vector<8x32xf32>
    %143 = vector.extract_strided_slice %140 {offsets = [0, 64], sizes = [8, 32], strides = [1, 1]} : vector<8x128xf32> to vector<8x32xf32>
    %144 = vector.extract_strided_slice %139 {offsets = [0, 96], sizes = [8, 32], strides = [1, 1]} : vector<8x128xf32> to vector<8x32xf32>
    %145 = arith.mulf %142, %129 : vector<8x32xf32>
    %146 = arith.mulf %141, %143 : vector<8x32xf32>
    %147 = arith.addf %145, %146 : vector<8x32xf32>
    %148 = math.tanh %147 : vector<8x32xf32>
    %149 = arith.mulf %144, %148 : vector<8x32xf32>
    %150 = tpu.concatenate %23, %41, %59, %77, %95, %113, %131, %149 in 0 : vector<8x32xf32>, vector<8x32xf32>, vector<8x32xf32>, vector<8x32xf32>, vector<8x32xf32>, vector<8x32xf32>, vector<8x32xf32>, vector<8x32xf32> -> vector<64x32xf32>
    %c0_23 = arith.constant 0 : index
    %c0_24 = arith.constant 0 : index
    %151 = vector.load %arg4[%c0_23, %c0_24] : memref<32x128xf32, #tpu.memory_space<vmem>>, vector<32x128xf32>
    %c0_25 = arith.constant 0 : index
    %c0_26 = arith.constant 0 : index
    %152 = vector.load %arg5[%c0_25, %c0_26] : memref<32x128xf32, #tpu.memory_space<vmem>>, vector<32x128xf32>
    %c0_27 = arith.constant 0 : index
    %c0_28 = arith.constant 0 : index
    %153 = vector.load %arg6[%c0_27, %c0_28] : memref<1x128xf32, #tpu.memory_space<vmem>>, vector<1x128xf32>
    %cst_29 = arith.constant dense<0.000000e+00> : vector<64x128xf32>
    %154 = tpu.matmul %150, %151, %cst_29 {dimension_numbers = #tpu.dot_dimension_numbers<[1], [0], [0], [1], [0, 0, 1, 1], [], []>} : vector<64x32xf32>, vector<32x128xf32>, vector<64x128xf32> -> vector<64x128xf32>
    %155 = vector.broadcast %153 : vector<1x128xf32> to vector<64x128xf32>
    %156 = arith.addf %154, %155 : vector<64x128xf32>
    %cst_30 = arith.constant 0.000000e+00 : f32
    %157 = vector.broadcast %cst_30 : f32 to vector<8x32xf32>
    %158 = vector.extract_strided_slice %156 {offsets = [0, 0], sizes = [8, 128], strides = [1, 1]} : vector<64x128xf32> to vector<8x128xf32>
    %159 = arith.negf %158 : vector<8x128xf32>
    %160 = math.exp %159 : vector<8x128xf32>
    %cst_31 = arith.constant 1.000000e+00 : f32
    %161 = vector.broadcast %cst_31 : f32 to vector<8x128xf32>
    %162 = arith.addf %161, %160 : vector<8x128xf32>
    %163 = arith.divf %161, %162 : vector<8x128xf32>
    %164 = math.tanh %158 : vector<8x128xf32>
    %165 = vector.extract_strided_slice %163 {offsets = [0, 0], sizes = [8, 32], strides = [1, 1]} : vector<8x128xf32> to vector<8x32xf32>
    %166 = vector.extract_strided_slice %163 {offsets = [0, 32], sizes = [8, 32], strides = [1, 1]} : vector<8x128xf32> to vector<8x32xf32>
    %167 = vector.extract_strided_slice %164 {offsets = [0, 64], sizes = [8, 32], strides = [1, 1]} : vector<8x128xf32> to vector<8x32xf32>
    %168 = vector.extract_strided_slice %163 {offsets = [0, 96], sizes = [8, 32], strides = [1, 1]} : vector<8x128xf32> to vector<8x32xf32>
    %169 = arith.mulf %166, %157 : vector<8x32xf32>
    %170 = arith.mulf %165, %167 : vector<8x32xf32>
    %171 = arith.addf %169, %170 : vector<8x32xf32>
    %172 = math.tanh %171 : vector<8x32xf32>
    %173 = arith.mulf %168, %172 : vector<8x32xf32>
    %174 = vector.extract_strided_slice %156 {offsets = [8, 0], sizes = [8, 128], strides = [1, 1]} : vector<64x128xf32> to vector<8x128xf32>
    %cst_32 = arith.constant dense<0.000000e+00> : vector<8x128xf32>
    %175 = tpu.matmul %173, %152, %cst_32 {dimension_numbers = #tpu.dot_dimension_numbers<[1], [0], [0], [1], [0, 0, 1, 1], [], []>} : vector<8x32xf32>, vector<32x128xf32>, vector<8x128xf32> -> vector<8x128xf32>
    %176 = arith.addf %174, %175 : vector<8x128xf32>
    %177 = arith.negf %176 : vector<8x128xf32>
    %178 = math.exp %177 : vector<8x128xf32>
    %cst_33 = arith.constant 1.000000e+00 : f32
    %179 = vector.broadcast %cst_33 : f32 to vector<8x128xf32>
    %180 = arith.addf %179, %178 : vector<8x128xf32>
    %181 = arith.divf %179, %180 : vector<8x128xf32>
    %182 = math.tanh %176 : vector<8x128xf32>
    %183 = vector.extract_strided_slice %181 {offsets = [0, 0], sizes = [8, 32], strides = [1, 1]} : vector<8x128xf32> to vector<8x32xf32>
    %184 = vector.extract_strided_slice %181 {offsets = [0, 32], sizes = [8, 32], strides = [1, 1]} : vector<8x128xf32> to vector<8x32xf32>
    %185 = vector.extract_strided_slice %182 {offsets = [0, 64], sizes = [8, 32], strides = [1, 1]} : vector<8x128xf32> to vector<8x32xf32>
    %186 = vector.extract_strided_slice %181 {offsets = [0, 96], sizes = [8, 32], strides = [1, 1]} : vector<8x128xf32> to vector<8x32xf32>
    %187 = arith.mulf %184, %171 : vector<8x32xf32>
    %188 = arith.mulf %183, %185 : vector<8x32xf32>
    %189 = arith.addf %187, %188 : vector<8x32xf32>
    %190 = math.tanh %189 : vector<8x32xf32>
    %191 = arith.mulf %186, %190 : vector<8x32xf32>
    %192 = vector.extract_strided_slice %156 {offsets = [16, 0], sizes = [8, 128], strides = [1, 1]} : vector<64x128xf32> to vector<8x128xf32>
    %cst_34 = arith.constant dense<0.000000e+00> : vector<8x128xf32>
    %193 = tpu.matmul %191, %152, %cst_34 {dimension_numbers = #tpu.dot_dimension_numbers<[1], [0], [0], [1], [0, 0, 1, 1], [], []>} : vector<8x32xf32>, vector<32x128xf32>, vector<8x128xf32> -> vector<8x128xf32>
    %194 = arith.addf %192, %193 : vector<8x128xf32>
    %195 = arith.negf %194 : vector<8x128xf32>
    %196 = math.exp %195 : vector<8x128xf32>
    %cst_35 = arith.constant 1.000000e+00 : f32
    %197 = vector.broadcast %cst_35 : f32 to vector<8x128xf32>
    %198 = arith.addf %197, %196 : vector<8x128xf32>
    %199 = arith.divf %197, %198 : vector<8x128xf32>
    %200 = math.tanh %194 : vector<8x128xf32>
    %201 = vector.extract_strided_slice %199 {offsets = [0, 0], sizes = [8, 32], strides = [1, 1]} : vector<8x128xf32> to vector<8x32xf32>
    %202 = vector.extract_strided_slice %199 {offsets = [0, 32], sizes = [8, 32], strides = [1, 1]} : vector<8x128xf32> to vector<8x32xf32>
    %203 = vector.extract_strided_slice %200 {offsets = [0, 64], sizes = [8, 32], strides = [1, 1]} : vector<8x128xf32> to vector<8x32xf32>
    %204 = vector.extract_strided_slice %199 {offsets = [0, 96], sizes = [8, 32], strides = [1, 1]} : vector<8x128xf32> to vector<8x32xf32>
    %205 = arith.mulf %202, %189 : vector<8x32xf32>
    %206 = arith.mulf %201, %203 : vector<8x32xf32>
    %207 = arith.addf %205, %206 : vector<8x32xf32>
    %208 = math.tanh %207 : vector<8x32xf32>
    %209 = arith.mulf %204, %208 : vector<8x32xf32>
    %210 = vector.extract_strided_slice %156 {offsets = [24, 0], sizes = [8, 128], strides = [1, 1]} : vector<64x128xf32> to vector<8x128xf32>
    %cst_36 = arith.constant dense<0.000000e+00> : vector<8x128xf32>
    %211 = tpu.matmul %209, %152, %cst_36 {dimension_numbers = #tpu.dot_dimension_numbers<[1], [0], [0], [1], [0, 0, 1, 1], [], []>} : vector<8x32xf32>, vector<32x128xf32>, vector<8x128xf32> -> vector<8x128xf32>
    %212 = arith.addf %210, %211 : vector<8x128xf32>
    %213 = arith.negf %212 : vector<8x128xf32>
    %214 = math.exp %213 : vector<8x128xf32>
    %cst_37 = arith.constant 1.000000e+00 : f32
    %215 = vector.broadcast %cst_37 : f32 to vector<8x128xf32>
    %216 = arith.addf %215, %214 : vector<8x128xf32>
    %217 = arith.divf %215, %216 : vector<8x128xf32>
    %218 = math.tanh %212 : vector<8x128xf32>
    %219 = vector.extract_strided_slice %217 {offsets = [0, 0], sizes = [8, 32], strides = [1, 1]} : vector<8x128xf32> to vector<8x32xf32>
    %220 = vector.extract_strided_slice %217 {offsets = [0, 32], sizes = [8, 32], strides = [1, 1]} : vector<8x128xf32> to vector<8x32xf32>
    %221 = vector.extract_strided_slice %218 {offsets = [0, 64], sizes = [8, 32], strides = [1, 1]} : vector<8x128xf32> to vector<8x32xf32>
    %222 = vector.extract_strided_slice %217 {offsets = [0, 96], sizes = [8, 32], strides = [1, 1]} : vector<8x128xf32> to vector<8x32xf32>
    %223 = arith.mulf %220, %207 : vector<8x32xf32>
    %224 = arith.mulf %219, %221 : vector<8x32xf32>
    %225 = arith.addf %223, %224 : vector<8x32xf32>
    %226 = math.tanh %225 : vector<8x32xf32>
    %227 = arith.mulf %222, %226 : vector<8x32xf32>
    %228 = vector.extract_strided_slice %156 {offsets = [32, 0], sizes = [8, 128], strides = [1, 1]} : vector<64x128xf32> to vector<8x128xf32>
    %cst_38 = arith.constant dense<0.000000e+00> : vector<8x128xf32>
    %229 = tpu.matmul %227, %152, %cst_38 {dimension_numbers = #tpu.dot_dimension_numbers<[1], [0], [0], [1], [0, 0, 1, 1], [], []>} : vector<8x32xf32>, vector<32x128xf32>, vector<8x128xf32> -> vector<8x128xf32>
    %230 = arith.addf %228, %229 : vector<8x128xf32>
    %231 = arith.negf %230 : vector<8x128xf32>
    %232 = math.exp %231 : vector<8x128xf32>
    %cst_39 = arith.constant 1.000000e+00 : f32
    %233 = vector.broadcast %cst_39 : f32 to vector<8x128xf32>
    %234 = arith.addf %233, %232 : vector<8x128xf32>
    %235 = arith.divf %233, %234 : vector<8x128xf32>
    %236 = math.tanh %230 : vector<8x128xf32>
    %237 = vector.extract_strided_slice %235 {offsets = [0, 0], sizes = [8, 32], strides = [1, 1]} : vector<8x128xf32> to vector<8x32xf32>
    %238 = vector.extract_strided_slice %235 {offsets = [0, 32], sizes = [8, 32], strides = [1, 1]} : vector<8x128xf32> to vector<8x32xf32>
    %239 = vector.extract_strided_slice %236 {offsets = [0, 64], sizes = [8, 32], strides = [1, 1]} : vector<8x128xf32> to vector<8x32xf32>
    %240 = vector.extract_strided_slice %235 {offsets = [0, 96], sizes = [8, 32], strides = [1, 1]} : vector<8x128xf32> to vector<8x32xf32>
    %241 = arith.mulf %238, %225 : vector<8x32xf32>
    %242 = arith.mulf %237, %239 : vector<8x32xf32>
    %243 = arith.addf %241, %242 : vector<8x32xf32>
    %244 = math.tanh %243 : vector<8x32xf32>
    %245 = arith.mulf %240, %244 : vector<8x32xf32>
    %246 = vector.extract_strided_slice %156 {offsets = [40, 0], sizes = [8, 128], strides = [1, 1]} : vector<64x128xf32> to vector<8x128xf32>
    %cst_40 = arith.constant dense<0.000000e+00> : vector<8x128xf32>
    %247 = tpu.matmul %245, %152, %cst_40 {dimension_numbers = #tpu.dot_dimension_numbers<[1], [0], [0], [1], [0, 0, 1, 1], [], []>} : vector<8x32xf32>, vector<32x128xf32>, vector<8x128xf32> -> vector<8x128xf32>
    %248 = arith.addf %246, %247 : vector<8x128xf32>
    %249 = arith.negf %248 : vector<8x128xf32>
    %250 = math.exp %249 : vector<8x128xf32>
    %cst_41 = arith.constant 1.000000e+00 : f32
    %251 = vector.broadcast %cst_41 : f32 to vector<8x128xf32>
    %252 = arith.addf %251, %250 : vector<8x128xf32>
    %253 = arith.divf %251, %252 : vector<8x128xf32>
    %254 = math.tanh %248 : vector<8x128xf32>
    %255 = vector.extract_strided_slice %253 {offsets = [0, 0], sizes = [8, 32], strides = [1, 1]} : vector<8x128xf32> to vector<8x32xf32>
    %256 = vector.extract_strided_slice %253 {offsets = [0, 32], sizes = [8, 32], strides = [1, 1]} : vector<8x128xf32> to vector<8x32xf32>
    %257 = vector.extract_strided_slice %254 {offsets = [0, 64], sizes = [8, 32], strides = [1, 1]} : vector<8x128xf32> to vector<8x32xf32>
    %258 = vector.extract_strided_slice %253 {offsets = [0, 96], sizes = [8, 32], strides = [1, 1]} : vector<8x128xf32> to vector<8x32xf32>
    %259 = arith.mulf %256, %243 : vector<8x32xf32>
    %260 = arith.mulf %255, %257 : vector<8x32xf32>
    %261 = arith.addf %259, %260 : vector<8x32xf32>
    %262 = math.tanh %261 : vector<8x32xf32>
    %263 = arith.mulf %258, %262 : vector<8x32xf32>
    %264 = vector.extract_strided_slice %156 {offsets = [48, 0], sizes = [8, 128], strides = [1, 1]} : vector<64x128xf32> to vector<8x128xf32>
    %cst_42 = arith.constant dense<0.000000e+00> : vector<8x128xf32>
    %265 = tpu.matmul %263, %152, %cst_42 {dimension_numbers = #tpu.dot_dimension_numbers<[1], [0], [0], [1], [0, 0, 1, 1], [], []>} : vector<8x32xf32>, vector<32x128xf32>, vector<8x128xf32> -> vector<8x128xf32>
    %266 = arith.addf %264, %265 : vector<8x128xf32>
    %267 = arith.negf %266 : vector<8x128xf32>
    %268 = math.exp %267 : vector<8x128xf32>
    %cst_43 = arith.constant 1.000000e+00 : f32
    %269 = vector.broadcast %cst_43 : f32 to vector<8x128xf32>
    %270 = arith.addf %269, %268 : vector<8x128xf32>
    %271 = arith.divf %269, %270 : vector<8x128xf32>
    %272 = math.tanh %266 : vector<8x128xf32>
    %273 = vector.extract_strided_slice %271 {offsets = [0, 0], sizes = [8, 32], strides = [1, 1]} : vector<8x128xf32> to vector<8x32xf32>
    %274 = vector.extract_strided_slice %271 {offsets = [0, 32], sizes = [8, 32], strides = [1, 1]} : vector<8x128xf32> to vector<8x32xf32>
    %275 = vector.extract_strided_slice %272 {offsets = [0, 64], sizes = [8, 32], strides = [1, 1]} : vector<8x128xf32> to vector<8x32xf32>
    %276 = vector.extract_strided_slice %271 {offsets = [0, 96], sizes = [8, 32], strides = [1, 1]} : vector<8x128xf32> to vector<8x32xf32>
    %277 = arith.mulf %274, %261 : vector<8x32xf32>
    %278 = arith.mulf %273, %275 : vector<8x32xf32>
    %279 = arith.addf %277, %278 : vector<8x32xf32>
    %280 = math.tanh %279 : vector<8x32xf32>
    %281 = arith.mulf %276, %280 : vector<8x32xf32>
    %282 = vector.extract_strided_slice %156 {offsets = [56, 0], sizes = [8, 128], strides = [1, 1]} : vector<64x128xf32> to vector<8x128xf32>
    %cst_44 = arith.constant dense<0.000000e+00> : vector<8x128xf32>
    %283 = tpu.matmul %281, %152, %cst_44 {dimension_numbers = #tpu.dot_dimension_numbers<[1], [0], [0], [1], [0, 0, 1, 1], [], []>} : vector<8x32xf32>, vector<32x128xf32>, vector<8x128xf32> -> vector<8x128xf32>
    %284 = arith.addf %282, %283 : vector<8x128xf32>
    %285 = arith.negf %284 : vector<8x128xf32>
    %286 = math.exp %285 : vector<8x128xf32>
    %cst_45 = arith.constant 1.000000e+00 : f32
    %287 = vector.broadcast %cst_45 : f32 to vector<8x128xf32>
    %288 = arith.addf %287, %286 : vector<8x128xf32>
    %289 = arith.divf %287, %288 : vector<8x128xf32>
    %290 = math.tanh %284 : vector<8x128xf32>
    %291 = vector.extract_strided_slice %289 {offsets = [0, 0], sizes = [8, 32], strides = [1, 1]} : vector<8x128xf32> to vector<8x32xf32>
    %292 = vector.extract_strided_slice %289 {offsets = [0, 32], sizes = [8, 32], strides = [1, 1]} : vector<8x128xf32> to vector<8x32xf32>
    %293 = vector.extract_strided_slice %290 {offsets = [0, 64], sizes = [8, 32], strides = [1, 1]} : vector<8x128xf32> to vector<8x32xf32>
    %294 = vector.extract_strided_slice %289 {offsets = [0, 96], sizes = [8, 32], strides = [1, 1]} : vector<8x128xf32> to vector<8x32xf32>
    %295 = arith.mulf %292, %279 : vector<8x32xf32>
    %296 = arith.mulf %291, %293 : vector<8x32xf32>
    %297 = arith.addf %295, %296 : vector<8x32xf32>
    %298 = math.tanh %297 : vector<8x32xf32>
    %299 = arith.mulf %294, %298 : vector<8x32xf32>
    %c0_46 = arith.constant 0 : index
    %c0_47 = arith.constant 0 : index
    %300 = vector.load %arg7[%c0_46, %c0_47] : memref<32x4xf32, #tpu.memory_space<vmem>>, vector<32x4xf32>
    %cst_48 = arith.constant dense<0.000000e+00> : vector<8x4xf32>
    %301 = tpu.matmul %299, %300, %cst_48 {dimension_numbers = #tpu.dot_dimension_numbers<[1], [0], [0], [1], [0, 0, 1, 1], [], []>} : vector<8x32xf32>, vector<32x4xf32>, vector<8x4xf32> -> vector<8x4xf32>
    %c0_49 = arith.constant 0 : index
    %c0_50 = arith.constant 0 : index
    %302 = vector.load %arg8[%c0_49, %c0_50] : memref<1x4xf32, #tpu.memory_space<vmem>>, vector<1x4xf32>
    %303 = vector.broadcast %302 : vector<1x4xf32> to vector<8x4xf32>
    %304 = arith.addf %301, %303 : vector<8x4xf32>
    %c0_51 = arith.constant 0 : index
    %c0_52 = arith.constant 0 : index
    %305 = vector.load %arg9[%c0_51, %c0_52] : memref<8x4xf32, #tpu.memory_space<vmem>>, vector<8x4xf32>
    tpu.vector_store %arg9[%c0_51, %c0_52], %304 {strides = array<i32>} : memref<8x4xf32, #tpu.memory_space<vmem>>, vector<8x4xf32>,
    return
  }
}

</mosaic_0001>

<bundles_post_ra>
// kernel: rnn_forward.1
= control target key start
LH: loop header
LB: loop body
LE: loop exit
PB: predicated region body
PF: predicated region fallthrough
CT: control target
= control target key end

     0   :  { %vm53_vm0 = vcmask 130048   ;;  %s2433_s19 = smov 32   ;;  %v2434_v19 = vmov 0.0|0.0   ;;  %vm2435_vm1 = vmmov 0   ;;  %v2436_v23 = vmov 0.0   ;;  %s2842_s1 = inlined_call_operand.vmem [shape: f32[16,128], index: 1, kind: input, shape index: {}]   ;;  %s2843_s0 = inlined_call_operand.vmem [shape: f32[64,16], index: 0, kind: input, shape index: {}]   ;;  %s2844_s3 = inlined_call_operand.vmem [shape: f32[1,128], index: 3, kind: input, shape index: {}]   ;;  %s2845_s2 = inlined_call_operand.vmem [shape: f32[32,128], index: 2, kind: input, shape index: {}]   ;;  %s2846_s4 = inlined_call_operand.vmem [shape: f32[32,128], index: 4, kind: input, shape index: {}]   ;;  %s2847_s6 = inlined_call_operand.vmem [shape: f32[1,128], index: 6, kind: input, shape index: {}]   ;;  %s2848_s5 = inlined_call_operand.vmem [shape: f32[32,128], index: 5, kind: input, shape index: {}]   ;;  %s2849_s7 = inlined_call_operand.vmem [shape: f32[32,4], index: 7, kind: input, shape index: {}]   ;;  %s2850_s8 = inlined_call_operand.vmem [shape: f32[1,4], index: 8, kind: input, shape index: {}]   ;;  %s2851_s9 = inlined_call_operand.vmem [shape: f32[8,4], index: 9, kind: output, shape index: {}]  }
   0x1   :  { %v40_v0 = vld [vmem:[%s2842_s1] sm:$0xff]  ;;  %v41_v1 = vld [vmem:[%s2842_s1 + $0x8] sm:$0xff]  ;;  %s2432_s1 = smov 64   ;;  %2201 = vmatprep.subr.bf16.mxu1 %v2434_v19  ;;  %v44_v22 = vld [vmem:[%s2845_s2 + $0x10] sm:$0xff]  ;;  %2020 = vmatprep.mubr.msk.f32.mxu1 %vm2435_vm1, %v2436_v23  ;;  %vm210_vm2 = vcmask 261120   ;;  %vm1843_vm3 = vcmask 31744  }
   0x2   :  { %v32_v2 = vld [vmem:[%s2843_s0] sm:$0xff]  ;;  %v2197_v3 = vpack.c.bf16 %v41_v1, %v40_v0  ;;  %v33_v4 = vld [vmem:[%s2843_s0 + $0x8] sm:$0xff]  ;;  %v45_v25 = vld [vmem:[%s2845_s2 + $0x18] sm:$0xff] }
   0x3   :  { %2000 = vmatprep.mubr.msk.f32.mxu0 %vm53_vm0, %v32_v2  ;;  %v2504_v5 = vld [vmem:[%s2844_s3] ss:$0 sm:$0xff]  ;;  %v43_v21 = vld [vmem:[%s2845_s2 + $0x8] sm:$0xff]  ;;  %v2528_v26 = vpack.c.bf16 %v45_v25, %v44_v22  ;;  %v34_v45 = vld [vmem:[%s2843_s0 + $0x10] sm:$0xff] }
   0x4   :  { %2198 = vmatprep.subr.bf16.mxu0 %v2197_v3  ;;  %v42_v20 = vld [vmem:[%s2845_s2] sm:$0xff]  ;;  %v35_v46 = vld [vmem:[%s2843_s0 + $0x18] sm:$0xff] }
   0x5   :  { %2200 = vmatpush3.bf16.msra.mxu0 %v2197_v3  ;;  %v2521_v24 = vpack.c.bf16 %v43_v21, %v42_v20  ;;  %v36_v3 = vld [vmem:[%s2843_s0 + $0x20] sm:$0xff] }
   0x6   :  { %2213 = vmatprep.subr.bf16.mxu0 %v2434_v19 }
   0x7   :  { %2203 = vmatpush3.bf16.msra.mxu1 %v2521_v24 }
   0x8   :  { %2001 = vmatmul.mubr.msk.f32.vlgmr.msra.gmra.mrb[0].mxu0 %vm53_vm0, %v33_v4  ;;  %2204 = vmatprep.subr.bf16.mxu1 %v2434_v19  ;;  %v37_v4 = vld [vmem:[%s2843_s0 + $0x28] sm:$0xff] }
   0x9   :  { %2215 = vmatpush3.bf16.msra.mxu0 %v2521_v24  ;;  %2003 = vmatprep.mubr.msk.f32.mxu0 %vm53_vm0, %v34_v45 }
   0xa   :  { %2216 = vmatprep.subr.bf16.mxu0 %v2434_v19 }
   0xb   :  { %2206 = vmatpush3.bf16.msra.mxu1 %v2528_v26 }
   0xc   :  { %2207 = vmatprep.subr.bf16.mxu1 %v2434_v19  ;;  %2004 = vmatmul.mubr.msk.f32.gmra.mrb[2].mxu0 %vm53_vm0, %v35_v46 }
   0xd   :  { %2218 = vmatpush3.bf16.msra.mxu0 %v2528_v26  ;;  %2006 = vmatprep.mubr.msk.f32.mxu0 %vm53_vm0, %v36_v3 }
   0xe   :  { %2225 = vmatprep.subr.bf16.mxu0 %v2434_v19 }
  0x10   :  { %2007 = vmatmul.mubr.msk.f32.gmra.mrb[4].mxu0 %vm53_vm0, %v37_v4 }
  0xdb   :  { %v2002_v6 = vpop.f32.mrb[0].mxu0 }
  0xdc   :  { %v144_v7 = vpop.f32.mrb[1].mxu0  ;;  %v150_v31 = vadd.f32 %v2002_v6, %v2504_v5  ;;  %v38_v6 = vld [vmem:[%s2843_s0 + $0x30] sm:$0xff] }
  0xdd   :  { %v145_v8 = vadd.f32 %v2504_v5, %v144_v7  ;;  %2009 = vmatprep.mubr.msk.f32.mxu0 %vm53_vm0, %v38_v6  ;;  %v39_v7 = vld [vmem:[%s2843_s0 + $0x38] sm:$0xff] }
  0xde   :  { %2010 = vmatmul.mubr.msk.f32.gmra.mrb[6].mxu0 %vm53_vm0, %v39_v7  ;;  %v908_v7 = vld [vmem:[%s2846_s4] sm:$0xff] }
  0xdf   :  { %2304 = vtanh.f32 %v145_v8  ;;  %v1858_v10 = vmul.f32 -1.442695, %v145_v8  ;;  %v2005_v50 = vpop.f32.mrb[2].mxu0  ;;  %2042 = vmatprep.mubr.msk.f32.mxu0 %vm2435_vm1, %v2436_v23 }
  0xe0   :  { %v154_v51 = vpop.f32.mrb[3].mxu0 }
  0xe1   :  { %2306 = vpow2.f32 %v1858_v10  ;;  %v155_v53 = vadd.f32 %v2504_v5, %v154_v51 }
  0xe9   :  { %v2305_v9 = vpop.eup %2304 }
  0xea   :  { %192 = vrot.lane.b32.xlu0 %v2305_v9, %s2432_s1 }
  0xeb   :  { %v2307_v11 = vpop.eup %2306 }
  0xec   :  { %v186_v12 = vadd.f32 1.0, %v2307_v11  ;;  %v2595_v11 = vpop.f32.mrb[4].mxu0 }
  0xee   :  { %2308 = vrcp.f32 %v186_v12  ;;  %v164_v12 = vpop.f32.mrb[5].mxu0 }
  0xf8   :  { %v2309_v13 = vpop.eup %2308 }
  0xf9   :  { %v190_v16 = vmul.f32 0.0, %v2309_v13 }
 0x15c   :  { %v193_v14 = vpop.permute.xlu0 %192 }
 0x15d   :  { %v195_v15 = vmul.f32 %v2309_v13, %v193_v14 }
 0x15f   :  { %197 = vrot.lane.b32.xlu0 %v195_v15, %s2433_s19 }
 0x1d1   :  { %v198_v17 = vpop.permute.xlu0 %197 }
 0x1d2   :  { %v200_v18 = vadd.f32 %v198_v17, %v190_v16  ;;  %v160_v16 = vadd.f32 %v2005_v50, %v2504_v5 }
 0x1d4   :  { %2310 = vtanh.f32 %v200_v18 }
 0x1de   :  { %v2311_v27 = vpop.eup %2310 }
 0x1df   :  { %203 = vrot.lane.b32.xlu1 %v2311_v27, %s2432_s1 }
 0x251   :  { %v204_v28 = vpop.permute.xlu1 %203 }
 0x252   :  { %v206_v29 = vmul.f32 %v2309_v13, %v204_v28  ;;  %v2597_v13 = vpop.f32.mrb[6].mxu0 }
 0x253   :  { %v2599_v14 = vpop.f32.mrb[7].mxu0 }
 0x254   :  { %208 = vrot.lane.b32.xlu1 %v206_v29, %s2433_s19 }
 0x2c6   :  { %v2539_v30 = vpop.permute.xlu1 %208 }
 0x2c7   :  { %2021 = vmatmul.mubr.msk.f32.vlgmr.msra.gmra.mrb[0].mxu1 %vm210_vm2, %v2539_v30 }
 0x2c8   :  { %2209 = vmatpush3.bf16.msra.mxu1 %v2521_v24  ;;  %2031 = vmatprep.mubr.msk.f32.mxu1 %vm2435_vm1, %v2436_v23 }
 0x2c9   :  { %2210 = vmatprep.subr.bf16.mxu1 %v2434_v19 }
 0x2cc   :  { %2212 = vmatpush3.bf16.msra.mxu1 %v2528_v26 }
 0x2cd   :  { %2219 = vmatprep.subr.bf16.mxu1 %v2434_v19 }
 0x39a   :  { %v279_v32 = vpop.f32.mrb[0].mxu1 }
 0x39b   :  { %v283_v33 = vadd.f32 %v279_v32, %v150_v31  ;;  %v2022_v34 = vpop.f32.mrb[1].mxu1 }
 0x39d   :  { %2312 = vtanh.f32 %v283_v33  ;;  %v1860_v36 = vmul.f32 -1.442695, %v283_v33 }
 0x39f   :  { %2314 = vpow2.f32 %v1860_v36 }
 0x3a7   :  { %v2313_v35 = vpop.eup %2312 }
 0x3a8   :  { %293 = vrot.lane.b32.xlu0 %v2313_v35, %s2432_s1 }
 0x3a9   :  { %v2315_v37 = vpop.eup %2314 }
 0x3aa   :  { %v287_v38 = vadd.f32 1.0, %v2315_v37 }
 0x3ac   :  { %2316 = vrcp.f32 %v287_v38 }
 0x3b6   :  { %v2317_v39 = vpop.eup %2316 }
 0x3b7   :  { %v291_v42 = vmul.f32 %v2317_v39, %v200_v18 }
 0x41a   :  { %v294_v40 = vpop.permute.xlu0 %293 }
 0x41b   :  { %v296_v41 = vmul.f32 %v2317_v39, %v294_v40 }
 0x41d   :  { %298 = vrot.lane.b32.xlu1 %v296_v41, %s2433_s19 }
 0x48f   :  { %v299_v43 = vpop.permute.xlu1 %298 }
 0x490   :  { %v301_v44 = vadd.f32 %v299_v43, %v291_v42 }
 0x492   :  { %2318 = vtanh.f32 %v301_v44 }
 0x49c   :  { %v2319_v47 = vpop.eup %2318 }
 0x49d   :  { %304 = vrot.lane.b32.xlu0 %v2319_v47, %s2432_s1 }
 0x50f   :  { %v305_v48 = vpop.permute.xlu0 %304 }
 0x510   :  { %v307_v49 = vmul.f32 %v2317_v39, %v305_v48  ;;  %v165_v39 = vadd.f32 %v2504_v5, %v164_v12 }
 0x512   :  { %309 = vrot.lane.b32.xlu1 %v307_v49, %s2433_s19 }
 0x584   :  { %v2562_v52 = vpop.permute.xlu1 %309 }
 0x585   :  { %2032 = vmatmul.mubr.msk.f32.vlgmr.msra.gmra.mrb[2].mxu1 %vm210_vm2, %v2562_v52 }
 0x586   :  { %2221 = vmatpush3.bf16.msra.mxu1 %v2521_v24  ;;  %2053 = vmatprep.mubr.msk.f32.mxu1 %vm2435_vm1, %v2436_v23 }
 0x587   :  { %2222 = vmatprep.subr.bf16.mxu1 %v2434_v19 }
 0x58a   :  { %2224 = vmatpush3.bf16.msra.mxu1 %v2528_v26 }
 0x58b   :  { %2231 = vmatprep.subr.bf16.mxu1 %v2434_v19 }
 0x658   :  { %v379_v54 = vpop.f32.mrb[2].mxu1 }
 0x659   :  { %v383_v55 = vadd.f32 %v379_v54, %v155_v53  ;;  %v2033_v56 = vpop.f32.mrb[3].mxu1 }
 0x65b   :  { %2320 = vtanh.f32 %v383_v55  ;;  %v1862_v58 = vmul.f32 -1.442695, %v383_v55 }
 0x65d   :  { %2322 = vpow2.f32 %v1862_v58  ;;  %v170_v58 = vadd.f32 %v2595_v11, %v2504_v5 }
 0x665   :  { %v2321_v57 = vpop.eup %2320 }
 0x666   :  { %393 = vrot.lane.b32.xlu0 %v2321_v57, %s2432_s1 }
 0x667   :  { %v2323_v59 = vpop.eup %2322 }
 0x668   :  { %v387_v60 = vadd.f32 1.0, %v2323_v59 }
 0x66a   :  { %2324 = vrcp.f32 %v387_v60 }
 0x674   :  { %v2325_v61 = vpop.eup %2324 }
 0x675   :  { %v391_v0 = vmul.f32 %v2325_v61, %v301_v44 }
 0x6d8   :  { %v394_v62 = vpop.permute.xlu0 %393 }
 0x6d9   :  { %v396_v63 = vmul.f32 %v2325_v61, %v394_v62 }
 0x6db   :  { %398 = vrot.lane.b32.xlu1 %v396_v63, %s2433_s19 }
 0x74d   :  { %v399_v1 = vpop.permute.xlu1 %398 }
 0x74e   :  { %v401_v2 = vadd.f32 %v399_v1, %v391_v0 }
 0x750   :  { %2326 = vtanh.f32 %v401_v2 }
 0x75a   :  { %v2327_v8 = vpop.eup %2326 }
 0x75b   :  { %404 = vrot.lane.b32.xlu0 %v2327_v8, %s2432_s1  ;;  %v909_v8 = vld [vmem:[%s2846_s4 + $0x8] sm:$0xff] }
 0x7cd   :  { %v405_v9 = vpop.permute.xlu0 %404 }
 0x7ce   :  { %v407_v10 = vmul.f32 %v2325_v61, %v405_v9  ;;  %v2243_v9 = vpack.c.bf16 %v909_v8, %v908_v7 }
 0x7d0   :  { %409 = vrot.lane.b32.xlu1 %v407_v10, %s2433_s19 }
 0x842   :  { %v2601_v15 = vpop.permute.xlu1 %409 }
 0x843   :  { %2043 = vmatmul.mubr.msk.f32.vlgmr.msra.gmra.mrb[8].mxu0 %vm210_vm2, %v2601_v15 }
 0x844   :  { %2227 = vmatpush3.bf16.msra.mxu0 %v2521_v24  ;;  %2064 = vmatprep.mubr.msk.f32.mxu0 %vm2435_vm1, %v2436_v23 }
 0x845   :  { %2228 = vmatprep.subr.bf16.mxu0 %v2434_v19 }
 0x848   :  { %2230 = vmatpush3.bf16.msra.mxu0 %v2528_v26 }
 0x849   :  { %2237 = vmatprep.subr.bf16.mxu0 %v2434_v19 }
 0x916   :  { %v479_v17 = vpop.f32.mrb[8].mxu0 }
 0x917   :  { %v483_v18 = vadd.f32 %v479_v17, %v160_v16  ;;  %v2044_v20 = vpop.f32.mrb[9].mxu0  ;;  %v910_v16 = vld [vmem:[%s2846_s4 + $0x10] sm:$0xff]  ;;  %v911_v17 = vld [vmem:[%s2846_s4 + $0x18] sm:$0xff] }
 0x919   :  { %2328 = vtanh.f32 %v483_v18  ;;  %v1864_v22 = vmul.f32 -1.442695, %v483_v18  ;;  %v2247_v18 = vpack.c.bf16 %v911_v17, %v910_v16 }
 0x91b   :  { %2330 = vpow2.f32 %v1864_v22 }
 0x923   :  { %v2329_v21 = vpop.eup %2328 }
 0x924   :  { %493 = vrot.lane.b32.xlu0 %v2329_v21, %s2432_s1 }
 0x925   :  { %v2331_v25 = vpop.eup %2330 }
 0x926   :  { %v487_v27 = vadd.f32 1.0, %v2331_v25 }
 0x928   :  { %2332 = vrcp.f32 %v487_v27 }
 0x932   :  { %v2333_v28 = vpop.eup %2332 }
 0x933   :  { %v491_v32 = vmul.f32 %v2333_v28, %v401_v2 }
 0x996   :  { %v494_v29 = vpop.permute.xlu0 %493 }
 0x997   :  { %v496_v31 = vmul.f32 %v2333_v28, %v494_v29 }
 0x999   :  { %498 = vrot.lane.b32.xlu1 %v496_v31, %s2433_s19 }
 0xa0b   :  { %v499_v33 = vpop.permute.xlu1 %498 }
 0xa0c   :  { %v501_v34 = vadd.f32 %v499_v33, %v491_v32 }
 0xa0e   :  { %2334 = vtanh.f32 %v501_v34 }
 0xa18   :  { %v2335_v35 = vpop.eup %2334 }
 0xa19   :  { %504 = vrot.lane.b32.xlu0 %v2335_v35, %s2432_s1 }
 0xa8b   :  { %v505_v36 = vpop.permute.xlu0 %504 }
 0xa8c   :  { %v507_v37 = vmul.f32 %v2333_v28, %v505_v36 }
 0xa8e   :  { %509 = vrot.lane.b32.xlu1 %v507_v37, %s2433_s19 }
 0xb00   :  { %v2616_v38 = vpop.permute.xlu1 %509 }
 0xb01   :  { %2054 = vmatmul.mubr.msk.f32.vlgmr.msra.gmra.mrb[4].mxu1 %vm210_vm2, %v2616_v38 }
 0xb02   :  { %2233 = vmatpush3.bf16.msra.mxu1 %v2521_v24  ;;  %2075 = vmatprep.mubr.msk.f32.mxu1 %vm2435_vm1, %v2436_v23 }
 0xb03   :  { %2234 = vmatprep.subr.bf16.mxu1 %v2434_v19 }
 0xb06   :  { %2236 = vmatpush3.bf16.msra.mxu1 %v2528_v26 }
 0xb07   :  { %2244 = vmatprep.subr.bf16.mxu1 %v2243_v9 }
 0xbd4   :  { %v579_v40 = vpop.f32.mrb[4].mxu1 }
 0xbd5   :  { %v583_v41 = vadd.f32 %v579_v40, %v165_v39  ;;  %v2055_v42 = vpop.f32.mrb[5].mxu1 }
 0xbd7   :  { %2336 = vtanh.f32 %v583_v41  ;;  %v1866_v44 = vmul.f32 -1.442695, %v583_v41 }
 0xbd9   :  { %2338 = vpow2.f32 %v1866_v44 }
 0xbe1   :  { %v2337_v43 = vpop.eup %2336 }
 0xbe2   :  { %593 = vrot.lane.b32.xlu0 %v2337_v43, %s2432_s1 }
 0xbe3   :  { %v2339_v45 = vpop.eup %2338 }
 0xbe4   :  { %v587_v46 = vadd.f32 1.0, %v2339_v45 }
 0xbe6   :  { %2340 = vrcp.f32 %v587_v46 }
 0xbf0   :  { %v2341_v47 = vpop.eup %2340 }
 0xbf1   :  { %v591_v50 = vmul.f32 %v2341_v47, %v501_v34 }
 0xc54   :  { %v594_v48 = vpop.permute.xlu0 %593 }
 0xc55   :  { %v596_v49 = vmul.f32 %v2341_v47, %v594_v48 }
 0xc57   :  { %598 = vrot.lane.b32.xlu1 %v596_v49, %s2433_s19 }
 0xcc9   :  { %v599_v51 = vpop.permute.xlu1 %598 }
 0xcca   :  { %v601_v53 = vadd.f32 %v599_v51, %v591_v50 }
 0xccc   :  { %2342 = vtanh.f32 %v601_v53 }
 0xcd6   :  { %v2343_v54 = vpop.eup %2342 }
 0xcd7   :  { %604 = vrot.lane.b32.xlu0 %v2343_v54, %s2432_s1 }
 0xd49   :  { %v605_v55 = vpop.permute.xlu0 %604 }
 0xd4a   :  { %v607_v56 = vmul.f32 %v2341_v47, %v605_v55 }
 0xd4c   :  { %609 = vrot.lane.b32.xlu1 %v607_v56, %s2433_s19  ;;  %v912_v56 = vld [vmem:[%s2848_s5] sm:$0xff] }
 0xdbe   :  { %v610_v57 = vpop.permute.xlu1 %609 }
 0xdbf   :  { %2065 = vmatmul.mubr.msk.f32.vlgmr.msra.gmra.mrb[10].mxu0 %vm210_vm2, %v610_v57 }
 0xdc0   :  { %2239 = vmatpush3.bf16.msra.mxu0 %v2521_v24  ;;  %2086 = vmatprep.mubr.msk.f32.mxu0 %vm2435_vm1, %v2436_v23 }
 0xdc1   :  { %2240 = vmatprep.subr.bf16.mxu0 %v2434_v19 }
 0xdc4   :  { %2242 = vmatpush3.bf16.msra.mxu0 %v2528_v26 }
 0xdc5   :  { %2251 = vmatprep.subr.bf16.mxu0 %v2434_v19 }
 0xe92   :  { %v679_v59 = vpop.f32.mrb[10].mxu0 }
 0xe93   :  { %v683_v60 = vadd.f32 %v679_v59, %v170_v58  ;;  %v2066_v61 = vpop.f32.mrb[11].mxu0  ;;  %v914_v59 = vld [vmem:[%s2848_s5 + $0x10] sm:$0xff] }
 0xe95   :  { %2344 = vtanh.f32 %v683_v60  ;;  %v1868_v24 = vmul.f32 -1.442695, %v683_v60  ;;  %v915_v60 = vld [vmem:[%s2848_s5 + $0x18] sm:$0xff] }
 0xe96   :  { %v2714_v61 = vpack.c.bf16 %v915_v60, %v914_v59 }
 0xe97   :  { %2346 = vpow2.f32 %v1868_v24 }
 0xe9f   :  { %v2345_v62 = vpop.eup %2344 }
 0xea0   :  { %693 = vrot.lane.b32.xlu0 %v2345_v62, %s2432_s1 }
 0xea1   :  { %v2347_v63 = vpop.eup %2346 }
 0xea2   :  { %v687_v0 = vadd.f32 1.0, %v2347_v63 }
 0xea4   :  { %2348 = vrcp.f32 %v687_v0 }
 0xeae   :  { %v2349_v1 = vpop.eup %2348 }
 0xeaf   :  { %v691_v3 = vmul.f32 %v2349_v1, %v601_v53 }
 0xf12   :  { %v694_v2 = vpop.permute.xlu0 %693 }
 0xf13   :  { %v696_v26 = vmul.f32 %v2349_v1, %v694_v2 }
 0xf15   :  { %698 = vrot.lane.b32.xlu1 %v696_v26, %s2433_s19  ;;  %v180_v26 = vadd.f32 %v2597_v13, %v2504_v5 }
 0xf87   :  { %v699_v4 = vpop.permute.xlu1 %698 }
 0xf88   :  { %v2641_v6 = vadd.f32 %v699_v4, %v691_v3 }
 0xf8a   :  { %2350 = vtanh.f32 %v2641_v6 }
 0xf94   :  { %v2351_v10 = vpop.eup %2350 }
 0xf95   :  { %704 = vrot.lane.b32.xlu0 %v2351_v10, %s2432_s1 }
0x1007   :  { %v705_v11 = vpop.permute.xlu0 %704 }
0x1008   :  { %v707_v12 = vmul.f32 %v2349_v1, %v705_v11 }
0x100a   :  { %709 = vrot.lane.b32.xlu1 %v707_v12, %s2433_s19 }
0x107c   :  { %v710_v20 = vpop.permute.xlu1 %709 }
0x107d   :  { %2076 = vmatmul.mubr.msk.f32.vlgmr.msra.gmra.mrb[6].mxu1 %vm210_vm2, %v710_v20 }
0x107e   :  { %2246 = vmatpush3.bf16.msra.mxu1 %v2243_v9  ;;  %2097 = vmatprep.mubr.msk.f32.mxu1 %vm210_vm2, %v2539_v30  ;;  %v175_v30 = vadd.f32 %v2504_v5, %v2599_v14 }
0x107f   :  { %2248 = vmatprep.subr.bf16.mxu1 %v2247_v18 }
0x1082   :  { %2250 = vmatpush3.bf16.msra.mxu1 %v2247_v18 }
0x1083   :  { %2263 = vmatprep.subr.bf16.mxu1 %v2434_v19 }
0x1085   :  { %2098 = vmatmul.mubr.msk.f32.vlgmr.msra.gmra.mrb[8].mxu1 %vm210_vm2, %v2562_v52  ;;  %v2675_v52 = vld [vmem:[%s2847_s6] ss:$0 sm:$0xff] }
0x1086   :  { %2100 = vmatprep.mubr.msk.f32.mxu1 %vm210_vm2, %v2601_v15 }
0x1089   :  { %2101 = vmatmul.mubr.msk.f32.gmra.mrb[10].mxu1 %vm210_vm2, %v2616_v38 }
0x108a   :  { %2103 = vmatprep.mubr.msk.f32.mxu1 %vm210_vm2, %v610_v57  ;;  %v913_v57 = vld [vmem:[%s2848_s5 + $0x8] sm:$0xff] }
0x108b   :  { %v2704_v58 = vpack.c.bf16 %v913_v57, %v912_v56 }
0x108d   :  { %2104 = vmatmul.mubr.msk.f32.gmra.mrb[12].mxu1 %vm210_vm2, %v710_v20 }
0x108e   :  { %2265 = vmatpush3.bf16.msra.mxu1 %v2704_v58 }
0x108f   :  { %2266 = vmatprep.subr.bf16.mxu1 %v2434_v19 }
0x1092   :  { %2268 = vmatpush3.bf16.msra.mxu1 %v2714_v61 }
0x1093   :  { %2275 = vmatprep.subr.bf16.mxu1 %v2434_v19 }
0x1150   :  { %v779_v21 = vpop.f32.mrb[6].mxu1 }
0x1151   :  { %v783_v22 = vadd.f32 %v779_v21, %v175_v30  ;;  %v2077_v25 = vpop.f32.mrb[7].mxu1 }
0x1153   :  { %2352 = vtanh.f32 %v783_v22  ;;  %v1870_v35 = vmul.f32 -1.442695, %v783_v22 }
0x1158   :  { %v2677_v15 = vpop.f32.mrb[8].mxu1 }
0x1159   :  { %v994_v27 = vpop.f32.mrb[9].mxu1  ;;  %v1000_v7 = vadd.f32 %v2677_v15, %v2675_v52 }
0x115a   :  { %v995_v28 = vadd.f32 %v2675_v52, %v994_v27 }
0x115c   :  { %2354 = vtanh.f32 %v995_v28  ;;  %v2680_v29 = vpop.f32.mrb[10].mxu1  ;;  %v1882_v36 = vmul.f32 -1.442695, %v995_v28 }
0x115d   :  { %v2353_v31 = vpop.eup %2352  ;;  %v2682_v32 = vpop.f32.mrb[11].mxu1  ;;  %2356 = vpow2.f32 %v1870_v35 }
0x115e   :  { %793 = vrot.lane.b32.xlu0 %v2353_v31, %s2432_s1  ;;  %2358 = vpow2.f32 %v1882_v36 }
0x1160   :  { %v2685_v14 = vpop.f32.mrb[12].mxu1 }
0x1161   :  { %v2687_v33 = vpop.f32.mrb[13].mxu1 }
0x1166   :  { %v2355_v34 = vpop.eup %2354 }
0x1167   :  { %1042 = vrot.lane.b32.xlu1 %v2355_v34, %s2432_s1  ;;  %v2357_v37 = vpop.eup %2356 }
0x1168   :  { %v787_v38 = vadd.f32 1.0, %v2357_v37  ;;  %v2359_v39 = vpop.eup %2358 }
0x1169   :  { %v1036_v40 = vadd.f32 1.0, %v2359_v39 }
0x116a   :  { %2360 = vrcp.f32 %v787_v38 }
0x116b   :  { %2362 = vrcp.f32 %v1036_v40 }
0x1174   :  { %v2361_v41 = vpop.eup %2360 }
0x1175   :  { %v2363_v44 = vpop.eup %2362  ;;  %v791_v47 = vmul.f32 %v2361_v41, %v2641_v6 }
0x1176   :  { %v1040_v50 = vmul.f32 0.0, %v2363_v44 }
0x11d0   :  { %v794_v42 = vpop.permute.xlu0 %793 }
0x11d1   :  { %v796_v43 = vmul.f32 %v2361_v41, %v794_v42 }
0x11d3   :  { %798 = vrot.lane.b32.xlu0 %v796_v43, %s2433_s19 }
0x11d9   :  { %v1043_v45 = vpop.permute.xlu1 %1042 }
0x11da   :  { %v1045_v46 = vmul.f32 %v2363_v44, %v1043_v45  ;;  %v1005_v45 = vadd.f32 %v2675_v52, %v2682_v32 }
0x11dc   :  { %1047 = vrot.lane.b32.xlu1 %v1045_v46, %s2433_s19 }
0x1245   :  { %v799_v48 = vpop.permute.xlu0 %798 }
0x1246   :  { %v2693_v49 = vadd.f32 %v799_v48, %v791_v47 }
0x1248   :  { %2364 = vtanh.f32 %v2693_v49 }
0x124e   :  { %v1048_v51 = vpop.permute.xlu1 %1047 }
0x124f   :  { %v1050_v53 = vadd.f32 %v1048_v51, %v1040_v50 }
0x1251   :  { %2366 = vtanh.f32 %v1050_v53 }
0x1252   :  { %v2365_v54 = vpop.eup %2364 }
0x1253   :  { %804 = vrot.lane.b32.xlu0 %v2365_v54, %s2432_s1 }
0x125b   :  { %v2367_v55 = vpop.eup %2366 }
0x125c   :  { %1053 = vrot.lane.b32.xlu1 %v2367_v55, %s2432_s1 }
0x12c5   :  { %v805_v62 = vpop.permute.xlu0 %804 }
0x12c6   :  { %v807_v24 = vmul.f32 %v2361_v41, %v805_v62 }
0x12c8   :  { %809 = vrot.lane.b32.xlu0 %v807_v24, %s2433_s19 }
0x12ce   :  { %v1054_v63 = vpop.permute.xlu1 %1053 }
0x12cf   :  { %v1056_v0 = vmul.f32 %v2363_v44, %v1054_v63 }
0x12d1   :  { %1058 = vrot.lane.b32.xlu1 %v1056_v0, %s2433_s19 }
0x133a   :  { %v810_v1 = vpop.permute.xlu0 %809 }
0x133b   :  { %2087 = vmatmul.mubr.msk.f32.vlgmr.msra.gmra.mrb[12].mxu0 %vm210_vm2, %v810_v1  ;;  %2106 = vmatprep.mubr.msk.f32.mxu1 %vm210_vm2, %v810_v1 }
0x133c   :  { %2253 = vmatpush3.bf16.msra.mxu0 %v2704_v58  ;;  %2117 = vmatprep.mubr.msk.f32.mxu0 %vm2435_vm1, %v2436_v23 }
0x133d   :  { %2254 = vmatprep.subr.bf16.mxu0 %v2434_v19 }
0x1340   :  { %2256 = vmatpush3.bf16.msra.mxu0 %v2714_v61 }
0x1341   :  { %2257 = vmatprep.subr.bf16.mxu0 %v2434_v19 }
0x1343   :  { %v1059_v2 = vpop.permute.xlu1 %1058 }
0x1344   :  { %2118 = vmatmul.mubr.msk.f32.vlgmr.msra.gmra.mrb[14].mxu0 %vm210_vm2, %v1059_v2 }
0x1345   :  { %2259 = vmatpush3.bf16.msra.mxu0 %v2704_v58  ;;  %2128 = vmatprep.mubr.msk.f32.mxu0 %vm2435_vm1, %v2436_v23 }
0x1346   :  { %2260 = vmatprep.subr.bf16.mxu0 %v2434_v19 }
0x1349   :  { %2262 = vmatpush3.bf16.msra.mxu0 %v2714_v61 }
0x134a   :  { %2269 = vmatprep.subr.bf16.mxu0 %v2434_v19 }
0x140e   :  { %v879_v3 = vpop.f32.mrb[12].mxu0 }
0x140f   :  { %v883_v4 = vadd.f32 %v879_v3, %v180_v26  ;;  %v2088_v6 = vpop.f32.mrb[13].mxu0  ;;  %v1010_v26 = vadd.f32 %v2680_v29, %v2675_v52 }
0x1411   :  { %v1872_v15 = vmul.f32 -1.442695, %v883_v4 }
0x1417   :  { %v1128_v8 = vpop.f32.mrb[14].mxu0 }
0x1418   :  { %v1132_v9 = vadd.f32 %v1128_v8, %v1000_v7  ;;  %v2119_v10 = vpop.f32.mrb[15].mxu0 }
0x141a   :  { %2368 = vtanh.f32 %v1132_v9  ;;  %v1884_v12 = vmul.f32 -1.442695, %v1132_v9 }
0x141c   :  { %2370 = vpow2.f32 %v1884_v12 }
0x1424   :  { %v2369_v11 = vpop.eup %2368 }
0x1425   :  { %1142 = vrot.lane.b32.xlu0 %v2369_v11, %s2432_s1 }
0x1426   :  { %v2371_v16 = vpop.eup %2370 }
0x1427   :  { %v1136_v17 = vadd.f32 1.0, %v2371_v16 }
0x1429   :  { %2372 = vrcp.f32 %v1136_v17 }
0x1433   :  { %v2373_v18 = vpop.eup %2372 }
0x1434   :  { %v1140_v20 = vmul.f32 %v2373_v18, %v1050_v53 }
0x1497   :  { %v1143_v5 = vpop.permute.xlu0 %1142 }
0x1498   :  { %v1145_v13 = vmul.f32 %v2373_v18, %v1143_v5 }
0x149a   :  { %1147 = vrot.lane.b32.xlu1 %v1145_v13, %s2433_s19 }
0x150c   :  { %v1148_v30 = vpop.permute.xlu1 %1147 }
0x150d   :  { %v1150_v21 = vadd.f32 %v1148_v30, %v1140_v20 }
0x150f   :  { %2374 = vtanh.f32 %v1150_v21 }
0x1510   :  { %2376 = vtanh.f32 %v883_v4 }
0x1511   :  { %2378 = vpow2.f32 %v1872_v15 }
0x1519   :  { %v2375_v22 = vpop.eup %2374 }
0x151a   :  { %1153 = vrot.lane.b32.xlu0 %v2375_v22, %s2432_s1  ;;  %v2377_v25 = vpop.eup %2376 }
0x151b   :  { %v2379_v27 = vpop.eup %2378 }
0x151c   :  { %v887_v28 = vadd.f32 1.0, %v2379_v27 }
0x151e   :  { %893 = vrot.lane.b32.xlu0 %v2377_v25, %s2432_s1  ;;  %2380 = vrcp.f32 %v887_v28 }
0x1528   :  { %v2381_v35 = vpop.eup %2380 }
0x1529   :  { %v891_v39 = vmul.f32 %v2381_v35, %v2693_v49 }
0x158c   :  { %v1154_v31 = vpop.permute.xlu0 %1153 }
0x158d   :  { %v1156_v34 = vmul.f32 %v2373_v18, %v1154_v31 }
0x158f   :  { %1158 = vrot.lane.b32.xlu1 %v1156_v34, %s2433_s19 }
0x1590   :  { %v894_v36 = vpop.permute.xlu0 %893 }
0x1591   :  { %v896_v37 = vmul.f32 %v2381_v35, %v894_v36 }
0x1593   :  { %898 = vrot.lane.b32.xlu0 %v896_v37, %s2433_s19 }
0x1601   :  { %v1159_v38 = vpop.permute.xlu1 %1158 }
0x1602   :  { %2129 = vmatmul.mubr.msk.f32.vlgmr.msra.gmra.mrb[16].mxu0 %vm210_vm2, %v1159_v38 }
0x1603   :  { %2271 = vmatpush3.bf16.msra.mxu0 %v2704_v58  ;;  %2150 = vmatprep.mubr.msk.f32.mxu0 %vm2435_vm1, %v2436_v23 }
0x1604   :  { %2272 = vmatprep.subr.bf16.mxu0 %v2434_v19 }
0x1605   :  { %v899_v40 = vpop.permute.xlu0 %898 }
0x1606   :  { %v901_v41 = vadd.f32 %v899_v40, %v891_v39 }
0x1607   :  { %2274 = vmatpush3.bf16.msra.mxu0 %v2714_v61 }
0x1608   :  { %2382 = vtanh.f32 %v901_v41  ;;  %2281 = vmatprep.subr.bf16.mxu0 %v2434_v19 }
0x1612   :  { %v2383_v42 = vpop.eup %2382 }
0x1613   :  { %904 = vrot.lane.b32.xlu0 %v2383_v42, %s2432_s1 }
0x1685   :  { %v905_v43 = vpop.permute.xlu0 %904 }
0x1686   :  { %v907_v44 = vmul.f32 %v2381_v35, %v905_v43 }
0x1688   :  { %924 = vrot.lane.b32.xlu0 %v907_v44, %s2433_s19  ;;  %v1020_v44 = vadd.f32 %v2685_v14, %v2675_v52 }
0x16d5   :  { %v1228_v46 = vpop.f32.mrb[16].mxu0 }
0x16d6   :  { %v1232_v47 = vadd.f32 %v1228_v46, %v1005_v45  ;;  %v2130_v48 = vpop.f32.mrb[17].mxu0 }
0x16d8   :  { %2384 = vtanh.f32 %v1232_v47  ;;  %v1886_v51 = vmul.f32 -1.442695, %v1232_v47 }
0x16da   :  { %2386 = vpow2.f32 %v1886_v51 }
0x16e2   :  { %v2385_v49 = vpop.eup %2384 }
0x16e3   :  { %1242 = vrot.lane.b32.xlu1 %v2385_v49, %s2432_s1 }
0x16e4   :  { %v2387_v53 = vpop.eup %2386 }
0x16e5   :  { %v1236_v54 = vadd.f32 1.0, %v2387_v53 }
0x16e7   :  { %2388 = vrcp.f32 %v1236_v54 }
0x16f1   :  { %v2389_v55 = vpop.eup %2388 }
0x16f2   :  { %v1240_v57 = vmul.f32 %v2389_v55, %v1150_v21  ;;  %v1015_v21 = vadd.f32 %v2675_v52, %v2687_v33 }
0x16fa   :  { %v925_v50 = vpop.permute.xlu0 %924 }
0x16fb   :  { %2107 = vmatmul.mubr.msk.f32.gmra.mrb[14].mxu1 %vm210_vm2, %v925_v50 }
0x16fc   :  { %2139 = vmatprep.mubr.msk.f32.mxu1 %vm2435_vm1, %v2436_v23 }
0x1755   :  { %v1243_v32 = vpop.permute.xlu1 %1242 }
0x1756   :  { %v1245_v56 = vmul.f32 %v2389_v55, %v1243_v32 }
0x1758   :  { %1247 = vrot.lane.b32.xlu1 %v1245_v56, %s2433_s19 }
0x17ca   :  { %v1248_v59 = vpop.permute.xlu1 %1247 }
0x17cb   :  { %v1250_v60 = vadd.f32 %v1248_v59, %v1240_v57 }
0x17cd   :  { %2390 = vtanh.f32 %v1250_v60 }
0x17ce   :  { %v2762_v62 = vpop.f32.mrb[14].mxu1 }
0x17cf   :  { %v2764_v24 = vpop.f32.mrb[15].mxu1 }
0x17d7   :  { %v2391_v63 = vpop.eup %2390 }
0x17d8   :  { %1253 = vrot.lane.b32.xlu1 %v2391_v63, %s2432_s1 }
0x184a   :  { %v1254_v0 = vpop.permute.xlu1 %1253 }
0x184b   :  { %v1256_v1 = vmul.f32 %v2389_v55, %v1254_v0 }
0x184d   :  { %1258 = vrot.lane.b32.xlu1 %v1256_v1, %s2433_s19 }
0x18bf   :  { %v1259_v2 = vpop.permute.xlu1 %1258 }
0x18c0   :  { %2140 = vmatmul.mubr.msk.f32.vlgmr.msra.gmra.mrb[16].mxu1 %vm210_vm2, %v1259_v2 }
0x18c1   :  { %2277 = vmatpush3.bf16.msra.mxu1 %v2704_v58  ;;  %2161 = vmatprep.mubr.msk.f32.mxu1 %vm2435_vm1, %v2436_v23 }
0x18c2   :  { %2278 = vmatprep.subr.bf16.mxu1 %v2434_v19 }
0x18c5   :  { %2280 = vmatpush3.bf16.msra.mxu1 %v2714_v61 }
0x18c6   :  { %2287 = vmatprep.subr.bf16.mxu1 %v2434_v19 }
0x1993   :  { %v1328_v3 = vpop.f32.mrb[16].mxu1 }
0x1994   :  { %v1332_v4 = vadd.f32 %v1328_v3, %v1010_v26  ;;  %v2141_v6 = vpop.f32.mrb[17].mxu1 }
0x1996   :  { %2392 = vtanh.f32 %v1332_v4  ;;  %v1888_v8 = vmul.f32 -1.442695, %v1332_v4 }
0x1998   :  { %2394 = vpow2.f32 %v1888_v8 }
0x19a0   :  { %v2393_v7 = vpop.eup %2392 }
0x19a1   :  { %1342 = vrot.lane.b32.xlu0 %v2393_v7, %s2432_s1 }
0x19a2   :  { %v2395_v9 = vpop.eup %2394 }
0x19a3   :  { %v1336_v10 = vadd.f32 1.0, %v2395_v9 }
0x19a5   :  { %2396 = vrcp.f32 %v1336_v10 }
0x19af   :  { %v2397_v11 = vpop.eup %2396 }
0x19b0   :  { %v1340_v17 = vmul.f32 %v2397_v11, %v1250_v60  ;;  %v1025_v60 = vadd.f32 %v2675_v52, %v2764_v24 }
0x1a13   :  { %v1343_v12 = vpop.permute.xlu0 %1342 }
0x1a14   :  { %v1345_v16 = vmul.f32 %v2397_v11, %v1343_v12 }
0x1a16   :  { %1347 = vrot.lane.b32.xlu1 %v1345_v16, %s2433_s19 }
0x1a88   :  { %v1348_v18 = vpop.permute.xlu1 %1347 }
0x1a89   :  { %v1350_v29 = vadd.f32 %v1348_v18, %v1340_v17  ;;  %v1030_v17 = vadd.f32 %v2762_v62, %v2675_v52  ;;  %v1757_v62 = vld [vmem:[%s2849_s7] sm:$0xff] }
0x1a8b   :  { %2398 = vtanh.f32 %v1350_v29 }
0x1a95   :  { %v2399_v5 = vpop.eup %2398 }
0x1a96   :  { %1353 = vrot.lane.b32.xlu0 %v2399_v5, %s2432_s1 }
0x1b08   :  { %v1354_v13 = vpop.permute.xlu0 %1353 }
0x1b09   :  { %v1356_v20 = vmul.f32 %v2397_v11, %v1354_v13 }
0x1b0b   :  { %1358 = vrot.lane.b32.xlu1 %v1356_v20, %s2433_s19 }
0x1b7d   :  { %v1359_v30 = vpop.permute.xlu1 %1358 }
0x1b7e   :  { %2151 = vmatmul.mubr.msk.f32.vlgmr.msra.gmra.mrb[18].mxu0 %vm210_vm2, %v1359_v30 }
0x1b7f   :  { %2283 = vmatpush3.bf16.msra.mxu0 %v2704_v58  ;;  %2172 = vmatprep.mubr.msk.f32.mxu0 %vm2435_vm1, %v2436_v23 }
0x1b80   :  { %2284 = vmatprep.subr.bf16.mxu0 %v2434_v19 }
0x1b83   :  { %2286 = vmatpush3.bf16.msra.mxu0 %v2714_v61 }
0x1b84   :  { %2293 = vmatprep.subr.bf16.mxu0 %v2434_v19 }
0x1c51   :  { %v1428_v22 = vpop.f32.mrb[18].mxu0 }
0x1c52   :  { %v1432_v25 = vadd.f32 %v1428_v22, %v1015_v21  ;;  %v2152_v15 = vpop.f32.mrb[19].mxu0 }
0x1c54   :  { %2400 = vtanh.f32 %v1432_v25  ;;  %v1890_v28 = vmul.f32 -1.442695, %v1432_v25 }
0x1c56   :  { %2402 = vpow2.f32 %v1890_v28 }
0x1c5e   :  { %v2401_v27 = vpop.eup %2400 }
0x1c5f   :  { %1442 = vrot.lane.b32.xlu0 %v2401_v27, %s2432_s1 }
0x1c60   :  { %v2403_v31 = vpop.eup %2402 }
0x1c61   :  { %v1436_v34 = vadd.f32 1.0, %v2403_v31  ;;  %v1758_v31 = vld [vmem:[%s2849_s7 + $0x8] sm:$0xff] }
0x1c63   :  { %2404 = vrcp.f32 %v1436_v34  ;;  %v1759_v34 = vld [vmem:[%s2849_s7 + $0x10] sm:$0xff] }
0x1c6d   :  { %v2405_v35 = vpop.eup %2404 }
0x1c6e   :  { %v1440_v38 = vmul.f32 %v2405_v35, %v1350_v29 }
0x1cd1   :  { %v1443_v36 = vpop.permute.xlu0 %1442 }
0x1cd2   :  { %v1445_v37 = vmul.f32 %v2405_v35, %v1443_v36  ;;  %v1760_v36 = vld [vmem:[%s2849_s7 + $0x18] sm:$0xff] }
0x1cd4   :  { %1447 = vrot.lane.b32.xlu1 %v1445_v37, %s2433_s19  ;;  %v2297_v37 = vpack.c.bf16 %v1760_v36, %v1759_v34 }
0x1d46   :  { %v1448_v39 = vpop.permute.xlu1 %1447 }
0x1d47   :  { %v1450_v33 = vadd.f32 %v1448_v39, %v1440_v38 }
0x1d49   :  { %2406 = vtanh.f32 %v1450_v33 }
0x1d53   :  { %v2407_v40 = vpop.eup %2406 }
0x1d54   :  { %1453 = vrot.lane.b32.xlu0 %v2407_v40, %s2432_s1 }
0x1dc6   :  { %v1454_v41 = vpop.permute.xlu0 %1453 }
0x1dc7   :  { %v1456_v42 = vmul.f32 %v2405_v35, %v1454_v41  ;;  %v2294_v35 = vpack.c.bf16 %v1758_v31, %v1757_v62  ;;  %v1897_v41 = vld [vmem:[%s2850_s8] ss:$0 sm:$0xff] }
0x1dc9   :  { %1458 = vrot.lane.b32.xlu1 %v1456_v42, %s2433_s19 }
0x1e3b   :  { %v1459_v43 = vpop.permute.xlu1 %1458 }
0x1e3c   :  { %2162 = vmatmul.mubr.msk.f32.vlgmr.msra.gmra.mrb[18].mxu1 %vm210_vm2, %v1459_v43 }
0x1e3d   :  { %2289 = vmatpush3.bf16.msra.mxu1 %v2704_v58  ;;  %2183 = vmatprep.mubr.msk.f32.mxu1 %vm2435_vm1, %v2436_v23 }
0x1e3e   :  { %2290 = vmatprep.subr.bf16.mxu1 %v2434_v19 }
0x1e41   :  { %2292 = vmatpush3.bf16.msra.mxu1 %v2714_v61 }
0x1f0f   :  { %v1528_v45 = vpop.f32.mrb[18].mxu1 }
0x1f10   :  { %v1532_v46 = vadd.f32 %v1528_v45, %v1020_v44  ;;  %v2163_v47 = vpop.f32.mrb[19].mxu1 }
0x1f12   :  { %2408 = vtanh.f32 %v1532_v46  ;;  %v1892_v49 = vmul.f32 -1.442695, %v1532_v46 }
0x1f14   :  { %2410 = vpow2.f32 %v1892_v49 }
0x1f1c   :  { %v2409_v48 = vpop.eup %2408 }
0x1f1d   :  { %1542 = vrot.lane.b32.xlu0 %v2409_v48, %s2432_s1 }
0x1f1e   :  { %v2411_v58 = vpop.eup %2410 }
0x1f1f   :  { %v1536_v50 = vadd.f32 1.0, %v2411_v58 }
0x1f21   :  { %2412 = vrcp.f32 %v1536_v50 }
0x1f2b   :  { %v2413_v51 = vpop.eup %2412 }
0x1f2c   :  { %v1540_v61 = vmul.f32 %v2413_v51, %v1450_v33 }
0x1f8f   :  { %v1543_v53 = vpop.permute.xlu0 %1542 }
0x1f90   :  { %v1545_v54 = vmul.f32 %v2413_v51, %v1543_v53 }
0x1f92   :  { %1547 = vrot.lane.b32.xlu1 %v1545_v54, %s2433_s19 }
0x2004   :  { %v1548_v55 = vpop.permute.xlu1 %1547 }
0x2005   :  { %v1550_v14 = vadd.f32 %v1548_v55, %v1540_v61 }
0x2007   :  { %2414 = vtanh.f32 %v1550_v14 }
0x2011   :  { %v2415_v32 = vpop.eup %2414 }
0x2012   :  { %1553 = vrot.lane.b32.xlu0 %v2415_v32, %s2432_s1 }
0x2084   :  { %v1554_v56 = vpop.permute.xlu0 %1553 }
0x2085   :  { %v1556_v57 = vmul.f32 %v2413_v51, %v1554_v56 }
0x2087   :  { %1558 = vrot.lane.b32.xlu1 %v1556_v57, %s2433_s19 }
0x20f9   :  { %v1559_v59 = vpop.permute.xlu1 %1558 }
0x20fa   :  { %2173 = vmatmul.mubr.msk.f32.vlgmr.msra.gmra.mrb[20].mxu0 %vm210_vm2, %v1559_v59 }
0x20fb   :  { %2194 = vmatprep.mubr.msk.f32.mxu0 %vm2435_vm1, %v2436_v23  ;;  %2295 = vmatpush3.bf16.msra.mxu0 %v2294_v35 }
0x20fc   :  { %2296 = vmatprep.subr.bf16.mxu0 %v2434_v19 }
0x20ff   :  { %2298 = vmatpush3.bf16.msra.mxu0 %v2297_v37 }
0x21cd   :  { %v1628_v63 = vpop.f32.mrb[20].mxu0 }
0x21ce   :  { %v1632_v0 = vadd.f32 %v1628_v63, %v1025_v60  ;;  %v2174_v1 = vpop.f32.mrb[21].mxu0 }
0x21d0   :  { %2416 = vtanh.f32 %v1632_v0  ;;  %v1894_v26 = vmul.f32 -1.442695, %v1632_v0 }
0x21d2   :  { %2418 = vpow2.f32 %v1894_v26 }
0x21da   :  { %v2417_v2 = vpop.eup %2416 }
0x21db   :  { %1642 = vrot.lane.b32.xlu0 %v2417_v2, %s2432_s1 }
0x21dc   :  { %v2419_v3 = vpop.eup %2418 }
0x21dd   :  { %v1636_v4 = vadd.f32 1.0, %v2419_v3 }
0x21df   :  { %2420 = vrcp.f32 %v1636_v4 }
0x21e9   :  { %v2421_v6 = vpop.eup %2420 }
0x21ea   :  { %v1640_v23 = vmul.f32 %v2421_v6, %v1550_v14 }
0x224d   :  { %v1643_v7 = vpop.permute.xlu0 %1642 }
0x224e   :  { %v1645_v8 = vmul.f32 %v2421_v6, %v1643_v7 }
0x2250   :  { %1647 = vrot.lane.b32.xlu1 %v1645_v8, %s2433_s19 }
0x22c2   :  { %v1648_v9 = vpop.permute.xlu1 %1647 }
0x22c3   :  { %v1650_v24 = vadd.f32 %v1648_v9, %v1640_v23 }
0x22c5   :  { %2422 = vtanh.f32 %v1650_v24 }
0x22cf   :  { %v2423_v10 = vpop.eup %2422 }
0x22d0   :  { %1653 = vrot.lane.b32.xlu0 %v2423_v10, %s2432_s1 }
0x2342   :  { %v1654_v11 = vpop.permute.xlu0 %1653 }
0x2343   :  { %v1656_v12 = vmul.f32 %v2421_v6, %v1654_v11 }
0x2345   :  { %1658 = vrot.lane.b32.xlu1 %v1656_v12, %s2433_s19 }
0x23b7   :  { %v1659_v16 = vpop.permute.xlu1 %1658 }
0x23b8   :  { %2184 = vmatmul.mubr.msk.f32.vlgmr.msra.gmra.mrb[20].mxu1 %vm210_vm2, %v1659_v16 }
0x248b   :  { %v1728_v18 = vpop.f32.mrb[20].mxu1 }
0x248c   :  { %v1732_v29 = vadd.f32 %v1728_v18, %v1030_v17  ;;  %v2185_v5 = vpop.f32.mrb[21].mxu1 }
0x248e   :  { %2424 = vtanh.f32 %v1732_v29  ;;  %v1896_v20 = vmul.f32 -1.442695, %v1732_v29 }
0x2490   :  { %2426 = vpow2.f32 %v1896_v20 }
0x2498   :  { %v2425_v13 = vpop.eup %2424 }
0x2499   :  { %1742 = vrot.lane.b32.xlu0 %v2425_v13, %s2432_s1 }
0x249a   :  { %v2427_v30 = vpop.eup %2426 }
0x249b   :  { %v1736_v21 = vadd.f32 1.0, %v2427_v30 }
0x249d   :  { %2428 = vrcp.f32 %v1736_v21 }
0x24a7   :  { %v2429_v22 = vpop.eup %2428 }
0x24a8   :  { %v1740_v27 = vmul.f32 %v2429_v22, %v1650_v24 }
0x250b   :  { %v1743_v25 = vpop.permute.xlu0 %1742 }
0x250c   :  { %v1745_v15 = vmul.f32 %v2429_v22, %v1743_v25 }
0x250e   :  { %1747 = vrot.lane.b32.xlu1 %v1745_v15, %s2433_s19 }
0x2580   :  { %v1748_v28 = vpop.permute.xlu1 %1747 }
0x2581   :  { %v1750_v52 = vadd.f32 %v1748_v28, %v1740_v27 }
0x2583   :  { %2430 = vtanh.f32 %v1750_v52 }
0x258d   :  { %v2431_v38 = vpop.eup %2430 }
0x258e   :  { %1753 = vrot.lane.b32.xlu0 %v2431_v38, %s2432_s1 }
0x2600   :  { %v1754_v39 = vpop.permute.xlu0 %1753 }
0x2601   :  { %v1756_v33 = vmul.f32 %v2429_v22, %v1754_v39 }
0x2603   :  { %1769 = vrot.lane.b32.xlu1 %v1756_v33, %s2433_s19 }
0x2675   :  { %v1770_v40 = vpop.permute.xlu1 %1769 }
0x2676   :  { %2195 = vmatmul.mubr.msk.f32.vlgmr.msra.gmra.mrb[22].mxu0 %vm210_vm2, %v1770_v40 }
0x2749   :  { %v1839_v42 = vpop.f32.mrb[22].mxu0 }
0x274a   :  { %v1840_v43 = vadd.f32 %v1897_v41, %v1839_v42  ;;  %v2196_v44 = vpop.f32.mrb[23].mxu0 }
0x274c   :  { %1844 = vst.msk [vmem:[%s2851_s9] sm:$0xff] %vm1843_vm3, %v1840_v43 }

</bundles_post_ra>
